<compile_context>
chip_gen: v5e
topology: v5e:2x2
jax: 0.10.0
libtpu: 0.0.40
codegen_flags: <defaults>
</compile_context>

<pallas_src>
import functools

import jax
import jax.numpy as jnp
from jax.experimental import pallas as pl
from jax.experimental.pallas import tpu as pltpu


def _tss_attention_kernel(temp_ref, x_ref, wqkv_ref, wout_ref, p_ref, bout_ref,
                          o_ref, *, bt, n, inner):
    """One batch tile per grid step.

    temp_ref : (1, inner)      f32   per-channel temperature (head value repeated)
    x_ref    : (bt, n, d)      f32/bf16  input tokens
    wqkv_ref : (d, inner)      bf16  qkv projection (pre-transposed)
    wout_ref : (inner, d)      bf16  output projection (pre-transposed)
    p_ref    : (inner, inner)  bf16  block-diagonal one-hot (same-head) matrix
    bout_ref : (1, d)          f32   output projection bias
    o_ref    : (bt, n, d)      out
    """
    d = x_ref.shape[-1]

    # ---- QKV projection (MXU, bf16 operands / f32 accumulation) -----------
    x = x_ref[...].reshape(bt * n, d).astype(jnp.bfloat16)
    w = jnp.dot(x, wqkv_ref[...],
                preferred_element_type=jnp.float32).reshape(bt, n, inner)

    # ---- Folded F.normalize(dim=-2): scaled = w^2 / max(||w[:,c]||^2, 1e-24)
    w2 = w * w
    col2 = jnp.sum(w2, axis=1, keepdims=True)                       # (bt,1,inner)
    inv_col2 = pl.reciprocal(jnp.maximum(col2, 1e-24), approx=True)
    scaled = w2 * inv_col2                                          # (bt,n,inner)
    # (w2 dies here; it is recomputed at the dots site so it is not kept live
    #  across the softmax section.)

    # ---- Per-head channel sums, lane-dense (one block-diagonal matmul) ----
    s_full = jnp.dot(scaled.reshape(bt * n, inner).astype(jnp.bfloat16),
                     p_ref[...],
                     preferred_element_type=jnp.float32
                     ).reshape(bt, n, inner)                        # (bt,n,inner)

    # ---- Softmax over tokens (values constant across channels of a head) --
    logits = s_full * temp_ref[...].reshape(1, 1, inner)
    m = jnp.max(logits, axis=1, keepdims=True)
    e = jnp.exp(logits - m)
    pi = e / jnp.sum(e, axis=1, keepdims=True)   # exact divide (correctness)

    # ---- dots / attn / out --------------------------------------------------
    inv_pisum = pl.reciprocal(jnp.sum(pi, axis=1, keepdims=True) + 1e-8,
                              approx=True)                          # (bt,1,inner)
    # inv_pisum hoisted out of the token reduction; w*w recomputed on purpose.
    dots = jnp.sum(pi * (w * w), axis=1, keepdims=True) * inv_pisum
    neg_attn = -pl.reciprocal(1.0 + dots, approx=True)              # (bt,1,inner)
    out = (w * pi) * neg_attn                                       # (bt,n,inner)

    # ---- Output projection (MXU) + bias ------------------------------------
    y = jnp.dot(out.reshape(bt * n, inner).astype(jnp.bfloat16),
                wout_ref[...],
                preferred_element_type=jnp.float32) + bout_ref[...]
    o_ref[...] = y.reshape(bt, n, d).astype(o_ref.dtype)


def _vmem_capacity_bytes():
    try:
        return int(pltpu.get_tpu_info().vmem_capacity_bytes)
    except Exception:
        return 64 << 20   # conservative default (v7x per-TensorCore VMEM)


def _vmem_bytes_needed(bt, n, d, inner, x_itemsize):
    io = 2 * 2 * bt * n * d * x_itemsize                     # x + o blocks, double buffered
    tmp = 5 * bt * n * inner * 4                             # live f32 (bt,n,inner) temporaries
    tmp += 2 * bt * n * max(d, inner) * 2                    # bf16 matmul operand copies
    wts = 2 * 2 * (d * inner + inner * d + inner * inner)    # bf16 weights (worst-case 2 bufs)
    misc = 4 * (inner + d) + (1 << 20)                       # temp/bias + compiler scratch slack
    return io + tmp + wts + misc


def _pick_batch_tile(b, n, d, inner, x_itemsize, vmem_budget):
    divisors = [t for t in range(b, 0, -1) if b % t == 0]
    fitting = [t for t in divisors
               if _vmem_bytes_needed(t, n, d, inner, x_itemsize) <= vmem_budget]
    if not fitting:
        return 1   # TODO(synk): n-tiled two-pass variant needed if even bt=1 overflows
    # Prefer >=4 grid steps (>=2 per TensorCore on v7x), then >=2, while keeping
    # M = bt*n large; otherwise take the largest tile that fits the budget.
    for pred in (lambda t: b // t >= 4 and t * n >= 256,
                 lambda t: b // t >= 2 and t * n >= 256,
                 lambda t: True):
        cands = [t for t in fitting if pred(t)]
        if cands:
            return cands[0]
    return fitting[0]


def tss_attention(x, wqkv, wout, bout, temp, *, num_heads, dim_head,
                  batch_tile=None, vmem_budget_bytes=None):
    b, n, d = x.shape
    inner = num_heads * dim_head
    assert wqkv.shape == (d, inner)
    assert wout.shape == (inner, d)
    assert bout.shape == (1, d)
    assert temp.shape == (num_heads, 1)

    phys_vmem = _vmem_capacity_bytes()
    if vmem_budget_bytes is None:
        vmem_budget_bytes = phys_vmem // 2        # leave headroom for compiler scratch
    if batch_tile is None:
        batch_tile = _pick_batch_tile(b, n, d, inner, x.dtype.itemsize,
                                      vmem_budget_bytes)
    assert b % batch_tile == 0
    grid = (b // batch_tile,)
    needed = _vmem_bytes_needed(batch_tile, n, d, inner, x.dtype.itemsize)
    vmem_limit = int(min(phys_vmem, max(needed + (8 << 20), 32 << 20)))

    # Host-side constants: per-channel temperature and block-diagonal one-hot.
    temp_full = jnp.repeat(temp.reshape(num_heads).astype(jnp.float32),
                           dim_head).reshape(1, inner)
    head_of_chan = jnp.arange(inner) // dim_head
    p_block = (head_of_chan[:, None] ==
               head_of_chan[None, :]).astype(jnp.bfloat16)            # (inner,inner)

    # bf16 weights for the MXU projections; statistics path stays f32.
    # (If the surrounding model already keeps x/activations in bf16, the kernel
    #  I/O is bf16 automatically: x is cast in-kernel only if needed.)
    wqkv_b = wqkv.astype(jnp.bfloat16)
    wout_b = wout.astype(jnp.bfloat16)
    bout_f = bout.astype(jnp.float32)

    kernel = functools.partial(_tss_attention_kernel, bt=batch_tile, n=n,
                               inner=inner)

    def build(resident_pipeline_mode):
        def resident(shape):
            kwargs = {}
            if resident_pipeline_mode is not None:
                kwargs["pipeline_mode"] = resident_pipeline_mode
            nd = len(shape)
            return pl.BlockSpec(shape, lambda *i: (0,) * nd, **kwargs)

        return pl.pallas_call(
            kernel,
            out_shape=jax.ShapeDtypeStruct((b, n, d), x.dtype),
            grid=grid,
            in_specs=[
                resident((1, inner)),                                  # temp
                pl.BlockSpec((batch_tile, n, d), lambda i: (i, 0, 0)), # x
                resident((d, inner)),                                  # wqkv bf16
                resident((inner, d)),                                  # wout bf16
                resident((inner, inner)),                              # one-hot P
                resident((1, d)),                                      # bout
            ],
            out_specs=pl.BlockSpec((batch_tile, n, d), lambda i: (i, 0, 0)),
            compiler_params=pltpu.CompilerParams(
                dimension_semantics=("parallel",),
                vmem_limit_bytes=vmem_limit),
        )

    args = (temp_full, x, wqkv_b, wout_b, p_block, bout_f)
    try:
        # Constant-index-map weight blocks: single-buffered pipelining.
        return build(pl.Buffered(1))(*args)
    except Exception:
        # Fallback if this jax build rejects pipeline_mode / Buffered(1).
        return build(None)(*args)


def tss_attention_reference(x, wqkv, wout, bout, temp, *, num_heads, dim_head):
    """Pure-JAX (f32, exact divides) reference matching the PyTorch forward."""
    b, n, d = x.shape
    H, Dh = num_heads, dim_head
    w = x @ wqkv                                          # (b, n, H*Dh)
    w = w.reshape(b, n, H, Dh).transpose(0, 2, 1, 3)      # (b, H, n, Dh)
    norm = jnp.sqrt(jnp.sum(w ** 2, axis=2, keepdims=True))
    wn = w / jnp.maximum(norm, 1e-12)                     # F.normalize(dim=-2)
    s = jnp.sum(wn ** 2, axis=-1)                         # (b, H, n)
    logits = s * temp                                     # temp (H,1) broadcast
    pi = jax.nn.softmax(logits, axis=-1)                  # (b, H, n)
    pin = pi / (jnp.sum(pi, axis=-1, keepdims=True) + 1e-8)
    dots = jnp.einsum('bhn,bhnd->bhd', pin, w ** 2)[:, :, None, :]
    attn = 1.0 / (1.0 + dots)
    out = -(w * pi[..., None]) * attn                     # (b, H, n, Dh)
    out = out.transpose(0, 2, 1, 3).reshape(b, n, H * Dh)
    return out @ wout + bout


if __name__ == "__main__":
    # Small, lane/sublane-dense config (d and inner multiples of 128, n of 8).
    B, N, DIM = 2, 64, 128
    NUM_HEADS, DIM_HEAD = 4, 32
    INNER = NUM_HEADS * DIM_HEAD

    key = jax.random.PRNGKey(0)
    kx, kqkv, kout, kb = jax.random.split(key, 4)

    x = jax.random.normal(kx, (B, N, DIM), dtype=jnp.float32)
    # Linear weights stored pre-transposed as (in, out).
    wqkv = jax.random.normal(kqkv, (DIM, INNER), dtype=jnp.float32) * 0.1
    wout = jax.random.normal(kout, (INNER, DIM), dtype=jnp.float32) * 0.1
    bout = jax.random.normal(kb, (1, DIM), dtype=jnp.float32) * 0.01
    temp = jnp.ones((NUM_HEADS, 1), dtype=jnp.float32)   # nn.Parameter(torch.ones(h,1))

    y = tss_attention(x, wqkv, wout, bout, temp,
                      num_heads=NUM_HEADS, dim_head=DIM_HEAD)
    y = jax.block_until_ready(y)

    y_ref = tss_attention_reference(x, wqkv, wout, bout, temp,
                                    num_heads=NUM_HEADS, dim_head=DIM_HEAD)
    assert y.shape == (B, N, DIM)
    # bf16 matmul operands + EUP approx reciprocals -> loosened tolerance.
    err = float(jnp.max(jnp.abs(y - y_ref)))
    scale = float(jnp.max(jnp.abs(y_ref)))
    assert err <= 2e-3 + 3e-2 * scale, ("mismatch vs reference", err, scale)

    print("KERNEL_OK")
</pallas_src>

<mosaic_0001>
module attributes {stable_mosaic.version = 11 : i64} {
  func.func @_tss_attention_kernel(%arg0: i32, %arg1: memref<1x128xf32, #tpu.memory_space<vmem>>, %arg2: memref<2x64x128xf32, #tpu.memory_space<vmem>>, %arg3: memref<128x128xbf16, #tpu.memory_space<vmem>>, %arg4: memref<128x128xbf16, #tpu.memory_space<vmem>>, %arg5: memref<128x128xbf16, #tpu.memory_space<vmem>>, %arg6: memref<1x128xf32, #tpu.memory_space<vmem>>, %arg7: memref<2x64x128xf32, #tpu.memory_space<vmem>>) attributes {dimension_semantics = [#tpu.dimension_semantics<parallel>], iteration_bounds = array<i64: 1>, scalar_prefetch = 0 : i64, scratch_operands = 0 : i64, tpu.core_type = #tpu.core_type<tc>, window_params = [{pipeline_mode = #tpu.pipeline_mode<synchronous>, transform_indices = @transform_0, window_bounds = array<i64: 1, 128>}, {transform_indices = @transform_1, window_bounds = array<i64: 2, 64, 128>}, {pipeline_mode = #tpu.pipeline_mode<synchronous>, transform_indices = @transform_2, window_bounds = array<i64: 128, 128>}, {pipeline_mode = #tpu.pipeline_mode<synchronous>, transform_indices = @transform_3, window_bounds = array<i64: 128, 128>}, {pipeline_mode = #tpu.pipeline_mode<synchronous>, transform_indices = @transform_4, window_bounds = array<i64: 128, 128>}, {pipeline_mode = #tpu.pipeline_mode<synchronous>, transform_indices = @transform_5, window_bounds = array<i64: 1, 128>}, {transform_indices = @transform_6, window_bounds = array<i64: 2, 64, 128>}]} {
    %c0 = arith.constant 0 : index
    %c0_0 = arith.constant 0 : index
    %c0_1 = arith.constant 0 : index
    %0 = vector.load %arg2[%c0, %c0_0, %c0_1] : memref<2x64x128xf32, #tpu.memory_space<vmem>>, vector<2x64x128xf32>
    %1 = vector.shape_cast %0 : vector<2x64x128xf32> to vector<128x128xf32>
    %2 = arith.truncf %1 : vector<128x128xf32> to vector<128x128xbf16>
    %c0_2 = arith.constant 0 : index
    %c0_3 = arith.constant 0 : index
    %3 = vector.load %arg3[%c0_2, %c0_3] : memref<128x128xbf16, #tpu.memory_space<vmem>>, vector<128x128xbf16>
    %cst = arith.constant dense<0.000000e+00> : vector<128x128xf32>
    %4 = tpu.matmul %2, %3, %cst {dimension_numbers = #tpu.dot_dimension_numbers<[1], [0], [0], [1], [0, 0, 1, 1], [], []>} : vector<128x128xbf16>, vector<128x128xbf16>, vector<128x128xf32> -> vector<128x128xf32>
    %5 = vector.shape_cast %4 : vector<128x128xf32> to vector<2x64x128xf32>
    %6 = arith.mulf %5, %5 : vector<2x64x128xf32>
    %cst_4 = arith.constant dense<0.000000e+00> : vector<2x128xf32>
    %7 = vector.multi_reduction <add>, %6, %cst_4 [1] : vector<2x64x128xf32> to vector<2x128xf32>
    %8 = vector.shape_cast %7 : vector<2x128xf32> to vector<2x1x128xf32>
    %cst_5 = arith.constant 1.000000e-24 : f32
    %9 = vector.broadcast %cst_5 : f32 to vector<2x1x128xf32>
    %10 = arith.maximumf %8, %9 : vector<2x1x128xf32>
    %11 = tpu.reciprocal %10 {approx = true} : vector<2x1x128xf32> -> vector<2x1x128xf32>
    %12 = vector.broadcast %11 : vector<2x1x128xf32> to vector<2x64x128xf32>
    %13 = arith.mulf %6, %12 : vector<2x64x128xf32>
    %14 = vector.shape_cast %13 : vector<2x64x128xf32> to vector<128x128xf32>
    %15 = arith.truncf %14 : vector<128x128xf32> to vector<128x128xbf16>
    %c0_6 = arith.constant 0 : index
    %c0_7 = arith.constant 0 : index
    %16 = vector.load %arg5[%c0_6, %c0_7] : memref<128x128xbf16, #tpu.memory_space<vmem>>, vector<128x128xbf16>
    %cst_8 = arith.constant dense<0.000000e+00> : vector<128x128xf32>
    %17 = tpu.matmul %15, %16, %cst_8 {dimension_numbers = #tpu.dot_dimension_numbers<[1], [0], [0], [1], [0, 0, 1, 1], [], []>} : vector<128x128xbf16>, vector<128x128xbf16>, vector<128x128xf32> -> vector<128x128xf32>
    %18 = vector.shape_cast %17 : vector<128x128xf32> to vector<2x64x128xf32>
    %c0_9 = arith.constant 0 : index
    %c0_10 = arith.constant 0 : index
    %19 = vector.load %arg1[%c0_9, %c0_10] : memref<1x128xf32, #tpu.memory_space<vmem>>, vector<1x128xf32>
    %20 = vector.shape_cast %19 : vector<1x128xf32> to vector<1x1x128xf32>
    %21 = vector.broadcast %20 : vector<1x1x128xf32> to vector<2x64x128xf32>
    %22 = arith.mulf %18, %21 : vector<2x64x128xf32>
    %cst_11 = arith.constant dense<0xFF800000> : vector<2x128xf32>
    %23 = vector.multi_reduction <maximumf>, %22, %cst_11 [1] : vector<2x64x128xf32> to vector<2x128xf32>
    %24 = vector.shape_cast %23 : vector<2x128xf32> to vector<2x1x128xf32>
    %25 = vector.broadcast %24 : vector<2x1x128xf32> to vector<2x64x128xf32>
    %26 = arith.subf %22, %25 : vector<2x64x128xf32>
    %27 = math.exp %26 : vector<2x64x128xf32>
    %cst_12 = arith.constant dense<0.000000e+00> : vector<2x128xf32>
    %28 = vector.multi_reduction <add>, %27, %cst_12 [1] : vector<2x64x128xf32> to vector<2x128xf32>
    %29 = vector.shape_cast %28 : vector<2x128xf32> to vector<2x1x128xf32>
    %30 = vector.broadcast %29 : vector<2x1x128xf32> to vector<2x64x128xf32>
    %31 = arith.divf %27, %30 : vector<2x64x128xf32>
    %cst_13 = arith.constant dense<0.000000e+00> : vector<2x128xf32>
    %32 = vector.multi_reduction <add>, %31, %cst_13 [1] : vector<2x64x128xf32> to vector<2x128xf32>
    %33 = vector.shape_cast %32 : vector<2x128xf32> to vector<2x1x128xf32>
    %cst_14 = arith.constant 9.99999993E-9 : f32
    %34 = vector.broadcast %cst_14 : f32 to vector<2x1x128xf32>
    %35 = arith.addf %33, %34 : vector<2x1x128xf32>
    %36 = tpu.reciprocal %35 {approx = true} : vector<2x1x128xf32> -> vector<2x1x128xf32>
    %37 = arith.mulf %5, %5 : vector<2x64x128xf32>
    %38 = arith.mulf %31, %37 : vector<2x64x128xf32>
    %cst_15 = arith.constant dense<0.000000e+00> : vector<2x128xf32>
    %39 = vector.multi_reduction <add>, %38, %cst_15 [1] : vector<2x64x128xf32> to vector<2x128xf32>
    %40 = vector.shape_cast %39 : vector<2x128xf32> to vector<2x1x128xf32>
    %41 = arith.mulf %40, %36 : vector<2x1x128xf32>
    %cst_16 = arith.constant 1.000000e+00 : f32
    %42 = vector.broadcast %cst_16 : f32 to vector<2x1x128xf32>
    %43 = arith.addf %42, %41 : vector<2x1x128xf32>
    %44 = tpu.reciprocal %43 {approx = true} : vector<2x1x128xf32> -> vector<2x1x128xf32>
    %cst_17 = arith.constant 0.000000e+00 : f32
    %45 = vector.broadcast %cst_17 : f32 to vector<2x1x128xf32>
    %46 = arith.subf %45, %44 : vector<2x1x128xf32>
    %47 = arith.mulf %5, %31 : vector<2x64x128xf32>
    %48 = vector.broadcast %46 : vector<2x1x128xf32> to vector<2x64x128xf32>
    %49 = arith.mulf %47, %48 : vector<2x64x128xf32>
    %50 = vector.shape_cast %49 : vector<2x64x128xf32> to vector<128x128xf32>
    %51 = arith.truncf %50 : vector<128x128xf32> to vector<128x128xbf16>
    %c0_18 = arith.constant 0 : index
    %c0_19 = arith.constant 0 : index
    %52 = vector.load %arg4[%c0_18, %c0_19] : memref<128x128xbf16, #tpu.memory_space<vmem>>, vector<128x128xbf16>
    %cst_20 = arith.constant dense<0.000000e+00> : vector<128x128xf32>
    %53 = tpu.matmul %51, %52, %cst_20 {dimension_numbers = #tpu.dot_dimension_numbers<[1], [0], [0], [1], [0, 0, 1, 1], [], []>} : vector<128x128xbf16>, vector<128x128xbf16>, vector<128x128xf32> -> vector<128x128xf32>
    %c0_21 = arith.constant 0 : index
    %c0_22 = arith.constant 0 : index
    %54 = vector.load %arg6[%c0_21, %c0_22] : memref<1x128xf32, #tpu.memory_space<vmem>>, vector<1x128xf32>
    %55 = vector.broadcast %54 : vector<1x128xf32> to vector<128x128xf32>
    %56 = arith.addf %53, %55 : vector<128x128xf32>
    %57 = vector.shape_cast %56 : vector<128x128xf32> to vector<2x64x128xf32>
    %c0_23 = arith.constant 0 : index
    %c0_24 = arith.constant 0 : index
    %c0_25 = arith.constant 0 : index
    %58 = vector.load %arg7[%c0_23, %c0_24, %c0_25] : memref<2x64x128xf32, #tpu.memory_space<vmem>>, vector<2x64x128xf32>
    tpu.vector_store %arg7[%c0_23, %c0_24, %c0_25], %57 {strides = array<i32>} : memref<2x64x128xf32, #tpu.memory_space<vmem>>, vector<2x64x128xf32>,
    return
  }
  func.func @transform_0(%arg0: i32) -> (i32, i32) {
    %c0_i32 = arith.constant 0 : i32
    %c0_i32_0 = arith.constant 0 : i32
    %c0_i32_1 = arith.constant 0 : i32
    return %c0_i32, %c0_i32_0 : i32, i32
  }
  func.func @transform_1(%arg0: i32) -> (i32, i32, i32) {
    %c0_i32 = arith.constant 0 : i32
    %c0_i32_0 = arith.constant 0 : i32
    %c0_i32_1 = arith.constant 0 : i32
    return %arg0, %c0_i32, %c0_i32_0 : i32, i32, i32
  }
  func.func @transform_2(%arg0: i32) -> (i32, i32) {
    %c0_i32 = arith.constant 0 : i32
    %c0_i32_0 = arith.constant 0 : i32
    %c0_i32_1 = arith.constant 0 : i32
    return %c0_i32, %c0_i32_0 : i32, i32
  }
  func.func @transform_3(%arg0: i32) -> (i32, i32) {
    %c0_i32 = arith.constant 0 : i32
    %c0_i32_0 = arith.constant 0 : i32
    %c0_i32_1 = arith.constant 0 : i32
    return %c0_i32, %c0_i32_0 : i32, i32
  }
  func.func @transform_4(%arg0: i32) -> (i32, i32) {
    %c0_i32 = arith.constant 0 : i32
    %c0_i32_0 = arith.constant 0 : i32
    %c0_i32_1 = arith.constant 0 : i32
    return %c0_i32, %c0_i32_0 : i32, i32
  }
  func.func @transform_5(%arg0: i32) -> (i32, i32) {
    %c0_i32 = arith.constant 0 : i32
    %c0_i32_0 = arith.constant 0 : i32
    %c0_i32_1 = arith.constant 0 : i32
    return %c0_i32, %c0_i32_0 : i32, i32
  }
  func.func @transform_6(%arg0: i32) -> (i32, i32, i32) {
    %c0_i32 = arith.constant 0 : i32
    %c0_i32_0 = arith.constant 0 : i32
    %c0_i32_1 = arith.constant 0 : i32
    return %arg0, %c0_i32, %c0_i32_0 : i32, i32, i32
  }
}

module attributes {stable_mosaic.version = 11 : i64} {
  func.func @_tss_attention_kernel(%arg0: i32, %arg1: memref<1x128xf32, #tpu.memory_space<vmem>>, %arg2: memref<2x64x128xf32, #tpu.memory_space<vmem>>, %arg3: memref<128x128xbf16, #tpu.memory_space<vmem>>, %arg4: memref<128x128xbf16, #tpu.memory_space<vmem>>, %arg5: memref<128x128xbf16, #tpu.memory_space<vmem>>, %arg6: memref<1x128xf32, #tpu.memory_space<vmem>>, %arg7: memref<2x64x128xf32, #tpu.memory_space<vmem>>) attributes {dimension_semantics = [#tpu.dimension_semantics<parallel>], iteration_bounds = array<i64: 1>, scalar_prefetch = 0 : i64, scratch_operands = 0 : i64, tpu.core_type = #tpu.core_type<tc>, window_params = [{pipeline_mode = #tpu.pipeline_mode<synchronous>, transform_indices = @transform_0, window_bounds = array<i64: 1, 128>}, {transform_indices = @transform_1, window_bounds = array<i64: 2, 64, 128>}, {pipeline_mode = #tpu.pipeline_mode<synchronous>, transform_indices = @transform_2, window_bounds = array<i64: 128, 128>}, {pipeline_mode = #tpu.pipeline_mode<synchronous>, transform_indices = @transform_3, window_bounds = array<i64: 128, 128>}, {pipeline_mode = #tpu.pipeline_mode<synchronous>, transform_indices = @transform_4, window_bounds = array<i64: 128, 128>}, {pipeline_mode = #tpu.pipeline_mode<synchronous>, transform_indices = @transform_5, window_bounds = array<i64: 1, 128>}, {transform_indices = @transform_6, window_bounds = array<i64: 2, 64, 128>}]} {
    %c0 = arith.constant 0 : index
    %c0_0 = arith.constant 0 : index
    %c0_1 = arith.constant 0 : index
    %0 = vector.load %arg2[%c0, %c0_0, %c0_1] : memref<2x64x128xf32, #tpu.memory_space<vmem>>, vector<2x64x128xf32>
    %1 = vector.shape_cast %0 : vector<2x64x128xf32> to vector<128x128xf32>
    %2 = arith.truncf %1 : vector<128x128xf32> to vector<128x128xbf16>
    %c0_2 = arith.constant 0 : index
    %c0_3 = arith.constant 0 : index
    %3 = vector.load %arg3[%c0_2, %c0_3] : memref<128x128xbf16, #tpu.memory_space<vmem>>, vector<128x128xbf16>
    %cst = arith.constant dense<0.000000e+00> : vector<128x128xf32>
    %4 = tpu.matmul %2, %3, %cst {dimension_numbers = #tpu.dot_dimension_numbers<[1], [0], [0], [1], [0, 0, 1, 1], [], []>} : vector<128x128xbf16>, vector<128x128xbf16>, vector<128x128xf32> -> vector<128x128xf32>
    %5 = vector.shape_cast %4 : vector<128x128xf32> to vector<2x64x128xf32>
    %6 = arith.mulf %5, %5 : vector<2x64x128xf32>
    %cst_4 = arith.constant dense<0.000000e+00> : vector<2x128xf32>
    %7 = vector.multi_reduction <add>, %6, %cst_4 [1] : vector<2x64x128xf32> to vector<2x128xf32>
    %8 = vector.shape_cast %7 : vector<2x128xf32> to vector<2x1x128xf32>
    %cst_5 = arith.constant 1.000000e-24 : f32
    %9 = vector.broadcast %cst_5 : f32 to vector<2x1x128xf32>
    %10 = arith.maximumf %8, %9 : vector<2x1x128xf32>
    %11 = tpu.reciprocal %10 {approx = true} : vector<2x1x128xf32> -> vector<2x1x128xf32>
    %12 = vector.broadcast %11 : vector<2x1x128xf32> to vector<2x64x128xf32>
    %13 = arith.mulf %6, %12 : vector<2x64x128xf32>
    %14 = vector.shape_cast %13 : vector<2x64x128xf32> to vector<128x128xf32>
    %15 = arith.truncf %14 : vector<128x128xf32> to vector<128x128xbf16>
    %c0_6 = arith.constant 0 : index
    %c0_7 = arith.constant 0 : index
    %16 = vector.load %arg5[%c0_6, %c0_7] : memref<128x128xbf16, #tpu.memory_space<vmem>>, vector<128x128xbf16>
    %cst_8 = arith.constant dense<0.000000e+00> : vector<128x128xf32>
    %17 = tpu.matmul %15, %16, %cst_8 {dimension_numbers = #tpu.dot_dimension_numbers<[1], [0], [0], [1], [0, 0, 1, 1], [], []>} : vector<128x128xbf16>, vector<128x128xbf16>, vector<128x128xf32> -> vector<128x128xf32>
    %18 = vector.shape_cast %17 : vector<128x128xf32> to vector<2x64x128xf32>
    %c0_9 = arith.constant 0 : index
    %c0_10 = arith.constant 0 : index
    %19 = vector.load %arg1[%c0_9, %c0_10] : memref<1x128xf32, #tpu.memory_space<vmem>>, vector<1x128xf32>
    %20 = vector.shape_cast %19 : vector<1x128xf32> to vector<1x1x128xf32>
    %21 = vector.broadcast %20 : vector<1x1x128xf32> to vector<2x64x128xf32>
    %22 = arith.mulf %18, %21 : vector<2x64x128xf32>
    %cst_11 = arith.constant dense<0xFF800000> : vector<2x128xf32>
    %23 = vector.multi_reduction <maximumf>, %22, %cst_11 [1] : vector<2x64x128xf32> to vector<2x128xf32>
    %24 = vector.shape_cast %23 : vector<2x128xf32> to vector<2x1x128xf32>
    %25 = vector.broadcast %24 : vector<2x1x128xf32> to vector<2x64x128xf32>
    %26 = arith.subf %22, %25 : vector<2x64x128xf32>
    %27 = math.exp %26 : vector<2x64x128xf32>
    %cst_12 = arith.constant dense<0.000000e+00> : vector<2x128xf32>
    %28 = vector.multi_reduction <add>, %27, %cst_12 [1] : vector<2x64x128xf32> to vector<2x128xf32>
    %29 = vector.shape_cast %28 : vector<2x128xf32> to vector<2x1x128xf32>
    %30 = vector.broadcast %29 : vector<2x1x128xf32> to vector<2x64x128xf32>
    %31 = arith.divf %27, %30 : vector<2x64x128xf32>
    %cst_13 = arith.constant dense<0.000000e+00> : vector<2x128xf32>
    %32 = vector.multi_reduction <add>, %31, %cst_13 [1] : vector<2x64x128xf32> to vector<2x128xf32>
    %33 = vector.shape_cast %32 : vector<2x128xf32> to vector<2x1x128xf32>
    %cst_14 = arith.constant 9.99999993E-9 : f32
    %34 = vector.broadcast %cst_14 : f32 to vector<2x1x128xf32>
    %35 = arith.addf %33, %34 : vector<2x1x128xf32>
    %36 = tpu.reciprocal %35 {approx = true} : vector<2x1x128xf32> -> vector<2x1x128xf32>
    %37 = arith.mulf %5, %5 : vector<2x64x128xf32>
    %38 = arith.mulf %31, %37 : vector<2x64x128xf32>
    %cst_15 = arith.constant dense<0.000000e+00> : vector<2x128xf32>
    %39 = vector.multi_reduction <add>, %38, %cst_15 [1] : vector<2x64x128xf32> to vector<2x128xf32>
    %40 = vector.shape_cast %39 : vector<2x128xf32> to vector<2x1x128xf32>
    %41 = arith.mulf %40, %36 : vector<2x1x128xf32>
    %cst_16 = arith.constant 1.000000e+00 : f32
    %42 = vector.broadcast %cst_16 : f32 to vector<2x1x128xf32>
    %43 = arith.addf %42, %41 : vector<2x1x128xf32>
    %44 = tpu.reciprocal %43 {approx = true} : vector<2x1x128xf32> -> vector<2x1x128xf32>
    %cst_17 = arith.constant 0.000000e+00 : f32
    %45 = vector.broadcast %cst_17 : f32 to vector<2x1x128xf32>
    %46 = arith.subf %45, %44 : vector<2x1x128xf32>
    %47 = arith.mulf %5, %31 : vector<2x64x128xf32>
    %48 = vector.broadcast %46 : vector<2x1x128xf32> to vector<2x64x128xf32>
    %49 = arith.mulf %47, %48 : vector<2x64x128xf32>
    %50 = vector.shape_cast %49 : vector<2x64x128xf32> to vector<128x128xf32>
    %51 = arith.truncf %50 : vector<128x128xf32> to vector<128x128xbf16>
    %c0_18 = arith.constant 0 : index
    %c0_19 = arith.constant 0 : index
    %52 = vector.load %arg4[%c0_18, %c0_19] : memref<128x128xbf16, #tpu.memory_space<vmem>>, vector<128x128xbf16>
    %cst_20 = arith.constant dense<0.000000e+00> : vector<128x128xf32>
    %53 = tpu.matmul %51, %52, %cst_20 {dimension_numbers = #tpu.dot_dimension_numbers<[1], [0], [0], [1], [0, 0, 1, 1], [], []>} : vector<128x128xbf16>, vector<128x128xbf16>, vector<128x128xf32> -> vector<128x128xf32>
    %c0_21 = arith.constant 0 : index
    %c0_22 = arith.constant 0 : index
    %54 = vector.load %arg6[%c0_21, %c0_22] : memref<1x128xf32, #tpu.memory_space<vmem>>, vector<1x128xf32>
    %55 = vector.broadcast %54 : vector<1x128xf32> to vector<128x128xf32>
    %56 = arith.addf %53, %55 : vector<128x128xf32>
    %57 = vector.shape_cast %56 : vector<128x128xf32> to vector<2x64x128xf32>
    %c0_23 = arith.constant 0 : index
    %c0_24 = arith.constant 0 : index
    %c0_25 = arith.constant 0 : index
    %58 = vector.load %arg7[%c0_23, %c0_24, %c0_25] : memref<2x64x128xf32, #tpu.memory_space<vmem>>, vector<2x64x128xf32>
    tpu.vector_store %arg7[%c0_23, %c0_24, %c0_25], %57 {strides = array<i32>} : memref<2x64x128xf32, #tpu.memory_space<vmem>>, vector<2x64x128xf32>,
    return
  }
  func.func @transform_0(%arg0: i32) -> (i32, i32) {
    %c0_i32 = arith.constant 0 : i32
    %c0_i32_0 = arith.constant 0 : i32
    %c0_i32_1 = arith.constant 0 : i32
    return %c0_i32, %c0_i32_0 : i32, i32
  }
  func.func @transform_1(%arg0: i32) -> (i32, i32, i32) {
    %c0_i32 = arith.constant 0 : i32
    %c0_i32_0 = arith.constant 0 : i32
    %c0_i32_1 = arith.constant 0 : i32
    return %arg0, %c0_i32, %c0_i32_0 : i32, i32, i32
  }
  func.func @transform_2(%arg0: i32) -> (i32, i32) {
    %c0_i32 = arith.constant 0 : i32
    %c0_i32_0 = arith.constant 0 : i32
    %c0_i32_1 = arith.constant 0 : i32
    return %c0_i32, %c0_i32_0 : i32, i32
  }
  func.func @transform_3(%arg0: i32) -> (i32, i32) {
    %c0_i32 = arith.constant 0 : i32
    %c0_i32_0 = arith.constant 0 : i32
    %c0_i32_1 = arith.constant 0 : i32
    return %c0_i32, %c0_i32_0 : i32, i32
  }
  func.func @transform_4(%arg0: i32) -> (i32, i32) {
    %c0_i32 = arith.constant 0 : i32
    %c0_i32_0 = arith.constant 0 : i32
    %c0_i32_1 = arith.constant 0 : i32
    return %c0_i32, %c0_i32_0 : i32, i32
  }
  func.func @transform_5(%arg0: i32) -> (i32, i32) {
    %c0_i32 = arith.constant 0 : i32
    %c0_i32_0 = arith.constant 0 : i32
    %c0_i32_1 = arith.constant 0 : i32
    return %c0_i32, %c0_i32_0 : i32, i32
  }
  func.func @transform_6(%arg0: i32) -> (i32, i32, i32) {
    %c0_i32 = arith.constant 0 : i32
    %c0_i32_0 = arith.constant 0 : i32
    %c0_i32_1 = arith.constant 0 : i32
    return %arg0, %c0_i32, %c0_i32_0 : i32, i32, i32
  }
}

</mosaic_0001>

<bundles_post_ra>
// kernel: tpu_custom_call.1
= control target key start
LH: loop header
LB: loop body
LE: loop exit
PB: predicated region body
PF: predicated region fallthrough
CT: control target
= control target key end

     0   :  { %11 = vsyncpa [#allocation3], 0  ;;  %s1603_s0 = inlined_call_operand.hbm [shape: f32[1,128], index: 0, kind: input, shape index: {}]   ;;  %s1604_s1 = inlined_call_operand.hbm [shape: f32[2,64,128], index: 1, kind: input, shape index: {}]   ;;  %s1605_s2 = inlined_call_operand.hbm [shape: bf16[128,128], index: 2, kind: input, shape index: {}]   ;;  %s1606_s3 = inlined_call_operand.hbm [shape: bf16[128,128], index: 3, kind: input, shape index: {}]   ;;  %s1607_s4 = inlined_call_operand.hbm [shape: bf16[128,128], index: 4, kind: input, shape index: {}]   ;;  %s1608_s5 = inlined_call_operand.vmem [shape: f32[1,128], index: 5, kind: input, shape index: {}]   ;;  %s1609_s6 = inlined_call_operand.hbm [shape: f32[2,64,128], index: 6, kind: output, shape index: {}]  }
   0x1   :  { %12 = vsyncpa [#allocation6], 0 }
   0x2   :  { %13 = vsyncpa [#allocation9], 0  ;;  %s30_s23 = sshll.u32 %s1604_s1, 4  ;;  %s31_s23 = int_to_ptr.hbm [resolvable:$true] %s30_s23 }
   0x3   :  { %14 = vsyncpa [#allocation4], 0  ;;  %s1214_s24 = smov [#allocation5]   ;;  %s1215_s26 = smov 128  }
   0x4   :  { %s32_s25 = sshll.u32 %s1214_s24, 4  ;;  %s1216_s27 = smov 8   ;;  %s33_s25 = int_to_ptr.vmem [resolvable:$true] %s32_s25 }
   0x5   :  { %38 = dma.hbm_to_vmem [thread:$0]  %s31_s23, 2048, %s33_s25, [#allocation6], %s1215_s26, %s1215_s26, %s1216_s27  }
   0x6   :  { %s56_s30 = sshll.u32 %s1606_s3, 4  ;;  %s1217_s7 = smov [#allocation8]   ;;  %s57_s30 = int_to_ptr.hbm [resolvable:$true] %s56_s30 }
   0x7   :  { %s58_s8 = sshll.u32 %s1217_s7, 4  ;;  %s20_s10 = sshll.u32 %s1603_s0, 4  ;;  %s59_s8 = int_to_ptr.vmem [resolvable:$true] %s58_s8  ;;  %s21_s10 = int_to_ptr.hbm [resolvable:$true] %s20_s10 }
   0x8   :  { %s1218_s11 = smov 64   ;;  %s1219_s12 = smov 4  }
   0x9   :  { %64 = dma.hbm_to_vmem [thread:$0]  %s57_s30, 1024, %s59_s8, [#allocation9], %s1218_s11, %s1218_s11, %s1219_s12  }
   0xa   :  { %s43_s15 = sshll.u32 %s1605_s2, 4  ;;  %s1220_s16 = smov [#allocation2]   ;;  %s44_s15 = int_to_ptr.hbm [resolvable:$true] %s43_s15 }
   0xb   :  { %s22_s17 = sshll.u32 %s1220_s16, 4  ;;  %s1221_s3 = smov [#allocation7]   ;;  %s23_s17 = int_to_ptr.vmem [resolvable:$true] %s22_s17 }
   0xc   :  { %25 = dma.hbm_to_vmem [thread:$0]  %s21_s10, 16, %s23_s17, [#allocation3]  }
   0xd   :  { %s45_s18 = sshll.u32 %s1221_s3, 4  ;;  %s69_s0 = sshll.u32 %s1607_s4, 4  ;;  %s46_s18 = int_to_ptr.vmem [resolvable:$true] %s45_s18  ;;  %s70_s0 = int_to_ptr.hbm [resolvable:$true] %s69_s0 }
   0xe   :  { %51 = dma.hbm_to_vmem [thread:$0]  %s44_s15, 1024, %s46_s18, [#allocation6], %s1218_s11, %s1218_s11, %s1219_s12  }
   0xf   :  { %s1222_s21 = smov [#allocation10]  }
  0x10   :  { %s71_s22 = sshll.u32 %s1222_s21, 4  ;;  %s72_s22 = int_to_ptr.vmem [resolvable:$true] %s71_s22 }
  0x11   :  { %77 = dma.hbm_to_vmem [thread:$0]  %s70_s0, 1024, %s72_s22, [#allocation9], %s1218_s11, %s1218_s11, %s1219_s12  }
  0x12   :  { %1206 = dma.done.wait [#allocation3], 16  }
  0x13   :  { %1207 = vsyncadd [#allocation3], 4294967280 }
  0x14   :  { %1208 = dma.done.wait [#allocation6], 3072  }
  0x15   :  { %1209 = vsyncadd [#allocation6], 4294964224 }
  0x16   :  { %1210 = dma.done.wait [#allocation9], 2048  }
  0x17   :  { %1211 = vsyncadd [#allocation9], 4294965248  ;;  %v961_v0 = vld [vmem:[#allocation7 + $0x38] sm:$0xff]  ;;  %v960_v1 = vld [vmem:[#allocation7 + $0x30] sm:$0xff]  ;;  %s843_s28 = sshll.u32 %s1609_s6, 4  ;;  %s844_s28 = int_to_ptr.hbm [resolvable:$true] %s843_s28 }
  0x18   :  { %188 = vmatpush.bf16.msra.mxu0 %v961_v0  ;;  %978 = vmatpush.bf16.msra.mxu3 %v961_v0  ;;  %v959_v2 = vld [vmem:[#allocation7 + $0x28] sm:$0xff]  ;;  %v958_v3 = vld [vmem:[#allocation7 + $0x20] sm:$0xff]  ;;  %v957_v4 = vld [vmem:[#allocation7 + $0x18] sm:$0xff] }
  0x19   :  { %v956_v5 = vld [vmem:[#allocation7 + $0x10] sm:$0xff]  ;;  %v955_v6 = vld [vmem:[#allocation7 + $0x8] sm:$0xff]  ;;  %v954_v7 = vld [vmem:[#allocation7] sm:$0xff] }
  0x1a   :  { %v100_v8 = vld [vmem:[#allocation5] sm:$0xff]  ;;  %v101_v9 = vld [vmem:[#allocation5 + $0x8] sm:$0xff]  ;;  %v102_v11 = vld [vmem:[#allocation5 + $0x10] sm:$0xff] }
  0x1b   :  { %v116_v10 = vpack.c.bf16 %v101_v9, %v100_v8  ;;  %v103_v12 = vld [vmem:[#allocation5 + $0x18] sm:$0xff]  ;;  %v104_v14 = vld [vmem:[#allocation5 + $0x20] sm:$0xff]  ;;  %v105_v15 = vld [vmem:[#allocation5 + $0x28] sm:$0xff] }
  0x1c   :  { %189 = vmatpush.bf16.msra.mxu0 %v960_v1  ;;  %979 = vmatpush.bf16.msra.mxu3 %v960_v1  ;;  %v117_v13 = vpack.c.bf16 %v103_v12, %v102_v11  ;;  %v118_v16 = vpack.c.bf16 %v105_v15, %v104_v14  ;;  %v112_v17 = vld [vmem:[#allocation5 + $0x60] sm:$0xff]  ;;  %v113_v18 = vld [vmem:[#allocation5 + $0x68] sm:$0xff]  ;;  %v106_v20 = vld [vmem:[#allocation5 + $0x30] sm:$0xff] }
  0x1d   :  { %v122_v19 = vpack.c.bf16 %v113_v18, %v112_v17  ;;  %v107_v21 = vld [vmem:[#allocation5 + $0x38] sm:$0xff]  ;;  %v114_v23 = vld [vmem:[#allocation5 + $0x70] sm:$0xff]  ;;  %v108_v26 = vld [vmem:[#allocation5 + $0x40] sm:$0xff] }
  0x1e   :  { %v119_v22 = vpack.c.bf16 %v107_v21, %v106_v20  ;;  %v115_v24 = vld [vmem:[#allocation5 + $0x78] sm:$0xff]  ;;  %v109_v27 = vld [vmem:[#allocation5 + $0x48] sm:$0xff]  ;;  %v110_v29 = vld [vmem:[#allocation5 + $0x50] sm:$0xff] }
  0x1f   :  { %v123_v25 = vpack.c.bf16 %v115_v24, %v114_v23  ;;  %v120_v28 = vpack.c.bf16 %v109_v27, %v108_v26  ;;  %v111_v30 = vld [vmem:[#allocation5 + $0x58] sm:$0xff]  ;;  %v968_v37 = vld [vmem:[#allocation10 + $0x30] sm:$0xff]  ;;  %v967_v38 = vld [vmem:[#allocation10 + $0x28] sm:$0xff] }
  0x20   :  { %190 = vmatpush.bf16.msra.mxu0 %v959_v2  ;;  %980 = vmatpush.bf16.msra.mxu3 %v959_v2  ;;  %v121_v31 = vpack.c.bf16 %v111_v30, %v110_v29  ;;  %v969_v35 = vld [vmem:[#allocation10 + $0x38] sm:$0xff]  ;;  %v966_v40 = vld [vmem:[#allocation10 + $0x20] sm:$0xff]  ;;  %v964_v43 = vld [vmem:[#allocation10 + $0x10] sm:$0xff] }
  0x21   :  { %371 = vmatpush.bf16.msra.mxu1 %v969_v35  ;;  %v965_v41 = vld [vmem:[#allocation10 + $0x18] sm:$0xff]  ;;  %v963_v45 = vld [vmem:[#allocation10 + $0x8] sm:$0xff]  ;;  %v962_v53 = vld [vmem:[#allocation10] sm:$0xff] }
  0x24   :  { %191 = vmatpush.bf16.msra.mxu0 %v958_v3  ;;  %981 = vmatpush.bf16.msra.mxu3 %v958_v3 }
  0x25   :  { %372 = vmatpush.bf16.msra.mxu1 %v968_v37 }
  0x28   :  { %192 = vmatpush.bf16.msra.mxu0 %v957_v4  ;;  %982 = vmatpush.bf16.msra.mxu3 %v957_v4 }
  0x29   :  { %373 = vmatpush.bf16.msra.mxu1 %v967_v38 }
  0x2c   :  { %193 = vmatpush.bf16.msra.mxu0 %v956_v5  ;;  %983 = vmatpush.bf16.msra.mxu3 %v956_v5 }
  0x2d   :  { %374 = vmatpush.bf16.msra.mxu1 %v966_v40 }
  0x30   :  { %194 = vmatpush.bf16.msra.mxu0 %v955_v6  ;;  %984 = vmatpush.bf16.msra.mxu3 %v955_v6 }
  0x31   :  { %375 = vmatpush.bf16.msra.mxu1 %v965_v41 }
  0x34   :  { %195 = vmatpush.bf16.msra.mxu0 %v954_v7  ;;  %985 = vmatpush.bf16.msra.mxu3 %v954_v7 }
  0x35   :  { %376 = vmatpush.bf16.msra.mxu1 %v964_v43 }
  0x37   :  { %196 = vmatmul.bf16.vlgmr.msra.gmra.mxu0 %v116_v10  ;;  %226 = vmatmul.bf16.vlgmr.msra.gmra.mxu3 %v122_v19 }
  0x38   :  { %986 = vmatpush.bf16.msrb.mxu3 %v969_v35 }
  0x39   :  { %377 = vmatpush.bf16.msra.mxu1 %v963_v45 }
  0x3c   :  { %987 = vmatpush.bf16.msrb.mxu3 %v968_v37 }
  0x3d   :  { %378 = vmatpush.bf16.msra.mxu1 %v962_v53 }
  0x40   :  { %988 = vmatpush.bf16.msrb.mxu3 %v967_v38 }
  0x44   :  { %989 = vmatpush.bf16.msrb.mxu3 %v966_v40 }
  0x47   :  { %201 = vmatmul.bf16.gmra.mxu0 %v117_v13  ;;  %231 = vmatmul.bf16.gmra.mxu3 %v123_v25 }
  0x48   :  { %990 = vmatpush.bf16.msrb.mxu3 %v965_v41 }
  0x4c   :  { %991 = vmatpush.bf16.msrb.mxu3 %v964_v43 }
  0x50   :  { %992 = vmatpush.bf16.msrb.mxu3 %v963_v45 }
  0x54   :  { %993 = vmatpush.bf16.msrb.mxu3 %v962_v53 }
  0x57   :  { %206 = vmatmul.bf16.gmra.mxu0 %v118_v16 }
  0x67   :  { %211 = vmatmul.bf16.gmra.mxu0 %v119_v22 }
  0x77   :  { %216 = vmatmul.bf16.gmra.mxu0 %v120_v28 }
  0x87   :  { %221 = vmatmul.bf16.gmra.mxu0 %v121_v31 }
  0xb4   :  { %v1277_v32 = vpop.f32.mrf.mxu0 }
  0xb5   :  { %v1295_v46 = vmul.f32 %v1277_v32, %v1277_v32 }
  0xba   :  { %v1333_v0 = vpop.f32.mrf.mxu3 }
  0xbb   :  { %v1366_v22 = vmul.f32 %v1333_v0, %v1333_v0 }
  0xbc   :  { %v1279_v33 = vpop.f32.mrf.mxu0 }
  0xbd   :  { %v1291_v44 = vmul.f32 %v1279_v33, %v1279_v33 }
  0xbf   :  { %v253_v48 = vadd.f32 %v1291_v44, %v1295_v46 }
  0xc2   :  { %v1339_v8 = vpop.f32.mrf.mxu3 }
  0xc3   :  { %v1374_v24 = vmul.f32 %v1339_v8, %v1339_v8 }
  0xc4   :  { %v1281_v34 = vpop.f32.mrf.mxu0 }
  0xc5   :  { %v1299_v47 = vmul.f32 %v1281_v34, %v1281_v34 }
  0xc7   :  { %v254_v51 = vadd.f32 %v253_v48, %v1299_v47 }
  0xca   :  { %v1353_v16 = vpop.f32.mrf.mxu3 }
  0xcb   :  { %1619 = vst [vmem:[#allocation19_spill] sm:$0xff] %v1353_v16  ;;  %v1382_v28 = vmul.f32 %v1353_v16, %v1353_v16 }
  0xcc   :  { %v1283_v36 = vpop.f32.mrf.mxu0 }
  0xcd   :  { %v1305_v49 = vmul.f32 %v1283_v36, %v1283_v36 }
  0xcf   :  { %v255_v54 = vadd.f32 %v254_v51, %v1305_v49 }
  0xd2   :  { %v1377_v26 = vpop.f32.mrf.mxu3 }
  0xd3   :  { %1621 = vst [vmem:[#allocation21_spill] sm:$0xff] %v1377_v26  ;;  %v1387_v30 = vmul.f32 %v1377_v26, %v1377_v26 }
  0xd4   :  { %v1285_v39 = vpop.f32.mrf.mxu0 }
  0xd5   :  { %v1312_v52 = vmul.f32 %v1285_v39, %v1285_v39 }
  0xd7   :  { %v256_v56 = vadd.f32 %v255_v54, %v1312_v52 }
  0xdc   :  { %v1287_v42 = vpop.f32.mrf.mxu0 }
  0xdd   :  { %v1317_v55 = vmul.f32 %v1287_v42, %v1287_v42 }
  0xdf   :  { %v257_v58 = vadd.f32 %v256_v56, %v1317_v55 }
  0xe4   :  { %v1307_v50 = vpop.f32.mrf.mxu0 }
  0xe5   :  { %v1322_v57 = vmul.f32 %v1307_v50, %v1307_v50 }
  0xe7   :  { %v258_v60 = vadd.f32 %v257_v58, %v1322_v57 }
  0xec   :  { %v1325_v59 = vpop.f32.mrf.mxu0 }
  0xed   :  { %v1330_v61 = vmul.f32 %v1325_v59, %v1325_v59 }
  0xef   :  { %v259_v62 = vadd.f32 %v258_v60, %v1330_v61 }
  0xf1   :  { %v260_v63 = vrot.slane %v259_v62, 4 }
  0xf3   :  { %v261_v1 = vadd.f32 %v260_v63, %v259_v62 }
  0xf4   :  { %v1335_v2 = vpop.f32.mrf.mxu0 }
  0xf5   :  { %1616 = vst [vmem:[#allocation16_spill] sm:$0xff] %v1335_v2  ;;  %v262_v3 = vrot.slane %v261_v1, 2  ;;  %v1343_v10 = vmul.f32 %v1335_v2, %v1335_v2 }
  0xf7   :  { %v263_v4 = vadd.f32 %v262_v3, %v261_v1 }
  0xf9   :  { %v264_v5 = vrot.slane %v263_v4, 1 }
  0xfb   :  { %v265_v6 = vadd.f32 %v264_v5, %v263_v4 }
  0xfc   :  { %v1337_v7 = vpop.f32.mrf.mxu0 }
  0xfd   :  { %1617 = vst [vmem:[#allocation17_spill] sm:$0xff] %v1337_v7  ;;  %v279_v9 = vmax.f32 %v265_v6, 1e-24  ;;  %v1347_v11 = vmul.f32 %v1337_v7, %v1337_v7 }
  0xff   :  { %1014 = vrcp.f32 %v279_v9  ;;  %v266_v17 = vadd.f32 %v1347_v11, %v1343_v10 }
 0x104   :  { %v1349_v12 = vpop.f32.mrf.mxu0 }
 0x105   :  { %1618 = vst [vmem:[#allocation18_spill] sm:$0xff] %v1349_v12  ;;  %v1015_v13 = vpop.eup %1014  ;;  %v1359_v18 = vmul.f32 %v1349_v12, %v1349_v12 }
 0x106   :  { %v283_v14 = vmul.f32 %v1015_v13, %v1295_v46  ;;  %v284_v15 = vmul.f32 %v1015_v13, %v1291_v44  ;;  %v285_v31 = vmul.f32 %v1015_v13, %v1299_v47  ;;  %v286_v35 = vmul.f32 %v1015_v13, %v1305_v49 }
 0x107   :  { %v267_v20 = vadd.f32 %v266_v17, %v1359_v18  ;;  %v287_v54 = vmul.f32 %v1015_v13, %v1312_v52  ;;  %v288_v56 = vmul.f32 %v1015_v13, %v1317_v55  ;;  %v289_v4 = vmul.f32 %v1015_v13, %v1322_v57 }
 0x108   :  { %v299_v19 = vpack.c.bf16 %v284_v15, %v283_v14  ;;  %v300_v40 = vpack.c.bf16 %v286_v35, %v285_v31  ;;  %v290_v5 = vmul.f32 %v1015_v13, %v1330_v61 }
 0x109   :  { %v301_v60 = vpack.c.bf16 %v288_v56, %v287_v54 }
 0x10a   :  { %379 = vmatmul.bf16.vlgmr.msra.gmra.mxu1 %v299_v19  ;;  %v302_v6 = vpack.c.bf16 %v290_v5, %v289_v4 }
 0x10c   :  { %v1362_v21 = vpop.f32.mrf.mxu0 }
 0x10d   :  { %1620 = vst [vmem:[#allocation20_spill] sm:$0xff] %v1362_v21  ;;  %v1370_v23 = vmul.f32 %v1362_v21, %v1362_v21 }
 0x10f   :  { %v268_v25 = vadd.f32 %v267_v20, %v1370_v23 }
 0x111   :  { %v269_v27 = vadd.f32 %v268_v25, %v1366_v22 }
 0x113   :  { %v270_v29 = vadd.f32 %v269_v27, %v1374_v24 }
 0x115   :  { %v271_v37 = vadd.f32 %v270_v29, %v1382_v28 }
 0x117   :  { %v272_v38 = vadd.f32 %v271_v37, %v1387_v30 }
 0x119   :  { %v273_v41 = vrot.slane %v272_v38, 4 }
 0x11a   :  { %384 = vmatmul.bf16.gmra.mxu1 %v300_v40 }
 0x11b   :  { %v274_v43 = vadd.f32 %v273_v41, %v272_v38 }
 0x11d   :  { %v275_v45 = vrot.slane %v274_v43, 2 }
 0x11f   :  { %v276_v48 = vadd.f32 %v275_v45, %v274_v43  ;;  %v1405_v43 = vld [vmem:[#allocation2] ss:$0 sm:$0xff] }
 0x121   :  { %v277_v51 = vrot.slane %v276_v48, 1 }
 0x123   :  { %v278_v53 = vadd.f32 %v277_v51, %v276_v48 }
 0x125   :  { %v280_v58 = vmax.f32 %v278_v53, 1e-24 }
 0x127   :  { %1016 = vrcp.f32 %v280_v58 }
 0x12a   :  { %389 = vmatmul.bf16.gmra.mxu1 %v301_v60 }
 0x12d   :  { %v1017_v62 = vpop.eup %1016 }
 0x12e   :  { %v295_v63 = vmul.f32 %v1017_v62, %v1366_v22  ;;  %v296_v1 = vmul.f32 %v1017_v62, %v1374_v24  ;;  %v297_v9 = vmul.f32 %v1017_v62, %v1382_v28  ;;  %v298_v14 = vmul.f32 %v1017_v62, %v1387_v30 }
 0x12f   :  { %v291_v17 = vmul.f32 %v1017_v62, %v1343_v10  ;;  %v292_v19 = vmul.f32 %v1017_v62, %v1347_v11  ;;  %v293_v25 = vmul.f32 %v1017_v62, %v1359_v18  ;;  %v294_v27 = vmul.f32 %v1017_v62, %v1370_v23 }
 0x130   :  { %v305_v3 = vpack.c.bf16 %v296_v1, %v295_v63  ;;  %v306_v15 = vpack.c.bf16 %v298_v14, %v297_v9 }
 0x131   :  { %v303_v20 = vpack.c.bf16 %v292_v19, %v291_v17  ;;  %v304_v29 = vpack.c.bf16 %v294_v27, %v293_v25 }
 0x132   :  { %409 = vmatmul.bf16.vlgmr.msrb.gmra.mxu3 %v305_v3 }
 0x13a   :  { %394 = vmatmul.bf16.gmra.mxu1 %v302_v6 }
 0x142   :  { %414 = vmatmul.bf16.gmra.mxu3 %v306_v15 }
 0x14a   :  { %399 = vmatmul.bf16.gmra.mxu1 %v303_v20 }
 0x15a   :  { %404 = vmatmul.bf16.gmra.mxu1 %v304_v29 }
 0x187   :  { %v380_v13 = vpop.f32.mrf.mxu1 }
 0x188   :  { %v424_v51 = vmul.f32 %v1405_v43, %v380_v13 }
 0x18f   :  { %v382_v31 = vpop.f32.mrf.mxu1 }
 0x190   :  { %v425_v53 = vmul.f32 %v1405_v43, %v382_v31 }
 0x197   :  { %v385_v35 = vpop.f32.mrf.mxu1 }
 0x198   :  { %v426_v45 = vmul.f32 %v1405_v43, %v385_v35 }
 0x19a   :  { %v440_v58 = vmax.f32 %v424_v51, %v426_v45 }
 0x19f   :  { %v387_v37 = vpop.f32.mrf.mxu1 }
 0x1a0   :  { %v427_v48 = vmul.f32 %v1405_v43, %v387_v37 }
 0x1a2   :  { %v441_v60 = vmax.f32 %v425_v53, %v427_v48 }
 0x1a7   :  { %v390_v38 = vpop.f32.mrf.mxu1 }
 0x1a8   :  { %v428_v54 = vmul.f32 %v1405_v43, %v390_v38 }
 0x1aa   :  { %v442_v1 = vmax.f32 %v440_v58, %v428_v54 }
 0x1af   :  { %v392_v40 = vpop.f32.mrf.mxu1 }
 0x1b0   :  { %v429_v56 = vmul.f32 %v1405_v43, %v392_v40 }
 0x1b2   :  { %v443_v3 = vmax.f32 %v441_v60, %v429_v56 }
 0x1b5   :  { %v410_v9 = vpop.f32.mrf.mxu3 }
 0x1b7   :  { %v395_v41 = vpop.f32.mrf.mxu1 }
 0x1b8   :  { %v430_v62 = vmul.f32 %v1405_v43, %v395_v41 }
 0x1ba   :  { %v444_v5 = vmax.f32 %v442_v1, %v430_v62 }
 0x1bd   :  { %v412_v27 = vpop.f32.mrf.mxu3 }
 0x1bf   :  { %v397_v63 = vpop.f32.mrf.mxu1 }
 0x1c0   :  { %v431_v4 = vmul.f32 %v1405_v43, %v397_v63 }
 0x1c2   :  { %v445_v6 = vmax.f32 %v443_v3, %v431_v4 }
 0x1c4   :  { %v446_v14 = vmax.f32 %v444_v5, %v445_v6 }
 0x1c5   :  { %v415_v5 = vpop.f32.mrf.mxu3 }
 0x1c6   :  { %v447_v15 = vrot.slane %v446_v14, 4 }
 0x1c7   :  { %v400_v17 = vpop.f32.mrf.mxu1 }
 0x1c8   :  { %v448_v19 = vmax.f32 %v446_v14, %v447_v15 }
 0x1ca   :  { %v449_v20 = vrot.slane %v448_v19, 2 }
 0x1cc   :  { %v450_v25 = vmax.f32 %v448_v19, %v449_v20 }
 0x1ce   :  { %v451_v29 = vrot.slane %v450_v25, 1 }
 0x1cf   :  { %v402_v13 = vpop.f32.mrf.mxu1 }
 0x1d0   :  { %v452_v31 = vmax.f32 %v450_v25, %v451_v29 }
 0x1d2   :  { %v466_v35 = vsub.f32 %v424_v51, %v452_v31  ;;  %v467_v37 = vsub.f32 %v425_v53, %v452_v31  ;;  %v468_v38 = vsub.f32 %v426_v45, %v452_v31  ;;  %v469_v40 = vsub.f32 %v427_v48, %v452_v31 }
 0x1d3   :  { %v470_v60 = vsub.f32 %v428_v54, %v452_v31  ;;  %v471_v1 = vsub.f32 %v429_v56, %v452_v31  ;;  %v472_v14 = vsub.f32 %v430_v62, %v452_v31  ;;  %v473_v20 = vsub.f32 %v431_v4, %v452_v31 }
 0x1d4   :  { %v482_v41 = vmul.f32 1.442695, %v466_v35  ;;  %v484_v58 = vmul.f32 1.442695, %v467_v37  ;;  %v486_v63 = vmul.f32 1.442695, %v468_v38  ;;  %v432_v48 = vmul.f32 %v1405_v43, %v400_v17 }
 0x1d5   :  { %v488_v3 = vmul.f32 1.442695, %v469_v40  ;;  %v490_v15 = vmul.f32 1.442695, %v470_v60  ;;  %v492_v51 = vmul.f32 1.442695, %v471_v1  ;;  %v436_v4 = vmul.f32 %v1405_v43, %v410_v9  ;;  %v417_v40 = vpop.f32.mrf.mxu3 }
 0x1d6   :  { %1018 = vpow2.f32 %v482_v41  ;;  %v494_v54 = vmul.f32 1.442695, %v472_v14  ;;  %v496_v29 = vmul.f32 1.442695, %v473_v20  ;;  %v433_v37 = vmul.f32 %v1405_v43, %v402_v13 }
 0x1d7   :  { %1020 = vpow2.f32 %v484_v58  ;;  %v405_v6 = vpop.f32.mrf.mxu1  ;;  %v437_v41 = vmul.f32 %v1405_v43, %v412_v27  ;;  %v439_v13 = vmul.f32 %v1405_v43, %v417_v40 }
 0x1d8   :  { %1022 = vpow2.f32 %v486_v63  ;;  %v434_v19 = vmul.f32 %v1405_v43, %v405_v6 }
 0x1d9   :  { %1024 = vpow2.f32 %v488_v3  ;;  %v438_v3 = vmul.f32 %v1405_v43, %v415_v5 }
 0x1da   :  { %1026 = vpow2.f32 %v490_v15  ;;  %v453_v25 = vmax.f32 %v432_v48, %v434_v19 }
 0x1db   :  { %1028 = vpow2.f32 %v492_v51 }
 0x1dc   :  { %v1416_v45 = vpop.eup %1018  ;;  %1030 = vpow2.f32 %v494_v54  ;;  %v455_v60 = vmax.f32 %v453_v25, %v436_v4 }
 0x1dd   :  { %v1419_v53 = vpop.eup %1020  ;;  %1032 = vpow2.f32 %v496_v29 }
 0x1de   :  { %v514_v56 = vadd.f32 %v1419_v53, %v1416_v45  ;;  %v1423_v62 = vpop.eup %1022  ;;  %v457_v20 = vmax.f32 %v455_v60, %v438_v3 }
 0x1df   :  { %v407_v35 = vpop.f32.mrf.mxu1  ;;  %v1429_v38 = vpop.eup %1024 }
 0x1e0   :  { %v515_v31 = vadd.f32 %v1423_v62, %v514_v56  ;;  %v435_v17 = vmul.f32 %v1405_v43, %v407_v35  ;;  %v1433_v1 = vpop.eup %1026 }
 0x1e1   :  { %v1438_v14 = vpop.eup %1028 }
 0x1e2   :  { %v516_v58 = vadd.f32 %v1429_v38, %v515_v31  ;;  %v454_v63 = vmax.f32 %v433_v37, %v435_v17  ;;  %v1441_v51 = vpop.eup %1030 }
 0x1e3   :  { %v1444_v25 = vpop.eup %1032 }
 0x1e4   :  { %v517_v9 = vadd.f32 %v1433_v1, %v516_v58  ;;  %v456_v6 = vmax.f32 %v454_v63, %v437_v41 }
 0x1e6   :  { %v518_v15 = vadd.f32 %v1438_v14, %v517_v9  ;;  %v458_v27 = vmax.f32 %v456_v6, %v439_v13 }
 0x1e8   :  { %v519_v54 = vadd.f32 %v1441_v51, %v518_v15  ;;  %v459_v56 = vmax.f32 %v457_v20, %v458_v27 }
 0x1ea   :  { %v520_v29 = vadd.f32 %v1444_v25, %v519_v54  ;;  %v460_v35 = vrot.slane %v459_v56, 4 }
 0x1ec   :  { %v521_v5 = vrot.slane %v520_v29, 4  ;;  %v461_v31 = vmax.f32 %v459_v56, %v460_v35 }
 0x1ee   :  { %v522_v43 = vadd.f32 %v521_v5, %v520_v29  ;;  %v462_v40 = vrot.slane %v461_v31, 2 }
 0x1f0   :  { %v523_v58 = vrot.slane %v522_v43, 2  ;;  %v463_v63 = vmax.f32 %v461_v31, %v462_v40 }
 0x1f2   :  { %v524_v26 = vadd.f32 %v523_v58, %v522_v43  ;;  %v464_v9 = vrot.slane %v463_v63, 1  ;;  %v977_v58 = vld [vmem:[#allocation8 + $0x38] sm:$0xff] }
 0x1f3   :  { %772 = vmatpush.bf16.msra.mxu2 %v977_v58  ;;  %994 = vmatpush.bf16.msra.mxu3 %v977_v58 }
 0x1f4   :  { %v525_v60 = vrot.slane %v524_v26, 1  ;;  %v465_v6 = vmax.f32 %v463_v63, %v464_v9 }
 0x1f6   :  { %v526_v16 = vadd.f32 %v525_v60, %v524_v26  ;;  %v474_v21 = vsub.f32 %v432_v48, %v465_v6  ;;  %v475_v12 = vsub.f32 %v433_v37, %v465_v6  ;;  %v476_v15 = vsub.f32 %v434_v19, %v465_v6 }
 0x1f7   :  { %v477_v20 = vsub.f32 %v435_v17, %v465_v6  ;;  %v478_v54 = vsub.f32 %v436_v4, %v465_v6  ;;  %v479_v56 = vsub.f32 %v437_v41, %v465_v6  ;;  %v480_v5 = vsub.f32 %v438_v3, %v465_v6 }
 0x1f8   :  { %1034 = vrcp.f32 %v526_v16  ;;  %v498_v27 = vmul.f32 1.442695, %v474_v21  ;;  %v500_v7 = vmul.f32 1.442695, %v475_v12  ;;  %v502_v2 = vmul.f32 1.442695, %v476_v15 }
 0x1f9   :  { %v504_v29 = vmul.f32 1.442695, %v477_v20  ;;  %v506_v31 = vmul.f32 1.442695, %v478_v54  ;;  %v481_v40 = vsub.f32 %v439_v13, %v465_v6  ;;  %v508_v26 = vmul.f32 1.442695, %v479_v56 }
 0x1fa   :  { %1036 = vpow2.f32 %v498_v27  ;;  %v551_v12 = vand.u32 2147483648, %v526_v16  ;;  %v510_v21 = vmul.f32 1.442695, %v480_v5  ;;  %vm545_vm1 = vweird.f32 %v526_v16  ;;  %v976_v27 = vld [vmem:[#allocation8 + $0x30] sm:$0xff] }
 0x1fb   :  { %1038 = vpow2.f32 %v500_v7  ;;  %v549_v7 = vand.u32 2147483647, %v526_v16  ;;  %v512_v41 = vmul.f32 1.442695, %v481_v40  ;;  %773 = vmatpush.bf16.msra.mxu2 %v976_v27  ;;  %995 = vmatpush.bf16.msra.mxu3 %v976_v27  ;;  %v973_v27 = vld [vmem:[#allocation8 + $0x18] sm:$0xff] }
 0x1fc   :  { %1040 = vpow2.f32 %v502_v2  ;;  %v552_v9 = vor.u32 1.1754944e-38, %v551_v12 }
 0x1fd   :  { %1042 = vpow2.f32 %v504_v29  ;;  %vm550_vm3 = vcmp.eq.f32.partialorder %v549_v7, 8.507059e+37 }
 0x1fe   :  { %v1035_v35 = vpop.eup %1034  ;;  %1044 = vpow2.f32 %v506_v31 }
 0x1ff   :  { %v541_v43 = vmul.f32 %v1035_v35, %v526_v16  ;;  %vm546_vm0 = vweird.f32 %v1035_v35  ;;  %1046 = vpow2.f32 %v508_v26  ;;  %v975_v26 = vld [vmem:[#allocation8 + $0x28] sm:$0xff] }
 0x200   :  { %v1447_v48 = vpop.eup %1036  ;;  %vm547_vm2 = vmor %vm545_vm1, %vm546_vm0  ;;  %1048 = vpow2.f32 %v510_v21  ;;  %774 = vmatpush.bf16.msra.mxu2 %v975_v26  ;;  %996 = vmatpush.bf16.msra.mxu3 %v975_v26 }
 0x201   :  { %v542_v19 = vsub.f32 1.0, %v541_v43  ;;  %v1449_v37 = vpop.eup %1038  ;;  %1050 = vpow2.f32 %v512_v41 }
 0x202   :  { %v527_v17 = vadd.f32 %v1449_v37, %v1447_v48  ;;  %v1453_v2 = vpop.eup %1040 }
 0x203   :  { %v543_v4 = vmul.f32 %v1035_v35, %v542_v19  ;;  %v1456_v63 = vpop.eup %1042 }
 0x204   :  { %v528_v13 = vadd.f32 %v1453_v2, %v527_v17  ;;  %v1459_v15 = vpop.eup %1044 }
 0x205   :  { %v544_v3 = vadd.f32 %v1035_v35, %v543_v4  ;;  %v1465_v56 = vpop.eup %1046 }
 0x206   :  { %v529_v6 = vadd.f32 %v1456_v63, %v528_v13  ;;  %v1476_v43 = vpop.eup %1048 }
 0x207   :  { %v548_v60 = vsel %vm547_vm2, %v1035_v35, %v544_v3  ;;  %v1486_v19 = vpop.eup %1050  ;;  %v974_v3 = vld [vmem:[#allocation8 + $0x20] sm:$0xff] }
 0x208   :  { %v553_v20 = vsel %vm550_vm3, %v552_v9, %v548_v60  ;;  %v530_v16 = vadd.f32 %v1459_v15, %v529_v6  ;;  %775 = vmatpush.bf16.msra.mxu2 %v974_v3  ;;  %997 = vmatpush.bf16.msra.mxu3 %v974_v3 }
 0x209   :  { %v1463_v54 = vmul.f32 %v1416_v45, %v553_v20  ;;  %v1468_v29 = vmul.f32 %v1419_v53, %v553_v20  ;;  %v1471_v35 = vmul.f32 %v1423_v62, %v553_v20  ;;  %v1479_v40 = vmul.f32 %v1429_v38, %v553_v20 }
 0x20a   :  { %v531_v5 = vadd.f32 %v1465_v56, %v530_v16  ;;  %v1489_v12 = vmul.f32 %v1433_v1, %v553_v20  ;;  %v1502_v13 = vmul.f32 %v1441_v51, %v553_v20  ;;  %v1508_v60 = vmul.f32 %v1444_v25, %v553_v20 }
 0x20b   :  { %v614_v31 = vmul.f32 %v1463_v54, %v1295_v46  ;;  %v584_v45 = vadd.f32 %v1468_v29, %v1463_v54  ;;  %v615_v53 = vmul.f32 %v1468_v29, %v1291_v44  ;;  %v616_v38 = vmul.f32 %v1471_v35, %v1299_v47 }
 0x20c   :  { %v532_v62 = vadd.f32 %v1476_v43, %v531_v5  ;;  %v1496_v44 = vmul.f32 %v1438_v14, %v553_v20  ;;  %v617_v17 = vmul.f32 %v1479_v40, %v1305_v49  ;;  %v618_v58 = vmul.f32 %v1489_v12, %v1312_v52  ;;  %776 = vmatpush.bf16.msra.mxu2 %v973_v27 }
 0x20d   :  { %v585_v46 = vadd.f32 %v584_v45, %v1471_v35  ;;  %v630_v21 = vadd.f32 %v615_v53, %v614_v31  ;;  %v620_v52 = vmul.f32 %v1502_v13, %v1322_v57  ;;  %v972_v53 = vld [vmem:[#allocation8 + $0x10] sm:$0xff]  ;;  %v621_v25 = vmul.f32 %v1508_v60, %v1330_v61  ;;  %998 = vmatpush.bf16.msra.mxu3 %v973_v27 }
 0x20e   :  { %v533_v4 = vadd.f32 %v1486_v19, %v532_v62  ;;  %v619_v6 = vmul.f32 %v1496_v44, %v1317_v55 }
 0x20f   :  { %v586_v7 = vadd.f32 %v585_v46, %v1479_v40  ;;  %v631_v41 = vadd.f32 %v630_v21, %v616_v38  ;;  %v971_v21 = vld [vmem:[#allocation8 + $0x8] sm:$0xff] }
 0x210   :  { %v534_v1 = vrot.slane %v533_v4, 4  ;;  %777 = vmatpush.bf16.msra.mxu2 %v972_v53 }
 0x211   :  { %v587_v47 = vadd.f32 %v586_v7, %v1489_v12  ;;  %v632_v9 = vadd.f32 %v631_v41, %v617_v17  ;;  %999 = vmatpush.bf16.msra.mxu3 %v972_v53  ;;  %v970_v41 = vld [vmem:[#allocation8] sm:$0xff] }
 0x212   :  { %v535_v14 = vadd.f32 %v534_v1, %v533_v4 }
 0x213   :  { %v588_v49 = vadd.f32 %v587_v47, %v1496_v44  ;;  %v633_v16 = vadd.f32 %v632_v9, %v618_v58 }
 0x214   :  { %v536_v51 = vrot.slane %v535_v14, 2  ;;  %778 = vmatpush.bf16.msra.mxu2 %v971_v21 }
 0x215   :  { %v589_v5 = vadd.f32 %v588_v49, %v1502_v13  ;;  %v634_v31 = vadd.f32 %v633_v16, %v619_v6  ;;  %1000 = vmatpush.bf16.msra.mxu3 %v971_v21 }
 0x216   :  { %v537_v45 = vadd.f32 %v536_v51, %v535_v14 }
 0x217   :  { %v590_v20 = vadd.f32 %v589_v5, %v1508_v60  ;;  %v635_v62 = vadd.f32 %v634_v31, %v620_v52 }
 0x218   :  { %v538_v55 = vrot.slane %v537_v45, 1  ;;  %779 = vmatpush.bf16.msra.mxu2 %v970_v41 }
 0x219   :  { %v591_v26 = vrot.slane %v590_v20, 4  ;;  %v636_v46 = vadd.f32 %v635_v62, %v621_v25  ;;  %1001 = vmatpush.bf16.msra.mxu3 %v970_v41 }
 0x21a   :  { %v539_v38 = vadd.f32 %v538_v55, %v537_v45 }
 0x21b   :  { %v592_v4 = vadd.f32 %v591_v26, %v590_v20  ;;  %v637_v7 = vrot.slane %v636_v46, 4 }
 0x21c   :  { %1052 = vrcp.f32 %v539_v38  ;;  %v573_v16 = vand.u32 2147483648, %v539_v38  ;;  %v571_v27 = vand.u32 2147483647, %v539_v38  ;;  %vm567_vm5 = vweird.f32 %v539_v38 }
 0x21d   :  { %v593_v57 = vrot.slane %v592_v4, 2  ;;  %v638_v17 = vadd.f32 %v637_v7, %v636_v46 }
 0x21e   :  { %v574_v31 = vor.u32 1.1754944e-38, %v573_v16  ;;  %vm572_vm7 = vcmp.eq.f32.partialorder %v571_v27, 8.507059e+37  ;;  %v670_v16 = vmul.f32 %v1502_v13, %v1307_v50 }
 0x21f   :  { %v594_v1 = vadd.f32 %v593_v57, %v592_v4  ;;  %v639_v61 = vrot.slane %v638_v17, 2 }
 0x221   :  { %v595_v3 = vrot.slane %v594_v1, 1  ;;  %v640_v14 = vadd.f32 %v639_v61, %v638_v17 }
 0x222   :  { %v1053_v47 = vpop.eup %1052 }
 0x223   :  { %v563_v58 = vmul.f32 %v1053_v47, %v539_v38  ;;  %v596_v9 = vadd.f32 %v595_v3, %v594_v1  ;;  %vm568_vm4 = vweird.f32 %v1053_v47  ;;  %v641_v5 = vrot.slane %v640_v14, 1 }
 0x224   :  { %vm569_vm6 = vmor %vm567_vm5, %vm568_vm4 }
 0x225   :  { %v564_v49 = vsub.f32 1.0, %v563_v58  ;;  %v610_v6 = vadd.f32 1e-08, %v596_v9  ;;  %v642_v25 = vadd.f32 %v641_v5, %v640_v14 }
 0x227   :  { %v565_v51 = vmul.f32 %v1053_v47, %v564_v49  ;;  %1054 = vrcp.f32 %v610_v6  ;;  %v665_v49 = vmul.f32 %v1468_v29, %v1279_v33  ;;  %v671_v29 = vmul.f32 %v1508_v60, %v1325_v59 }
 0x228   :  { %v666_v60 = vmul.f32 %v1471_v35, %v1281_v34  ;;  %v1622_v35 = vld [vmem:[#allocation16_spill] sm:$0xff] }
 0x229   :  { %v566_v52 = vadd.f32 %v1053_v47, %v565_v51 }
 0x22b   :  { %v570_v45 = vsel %vm569_vm6, %v1053_v47, %v566_v52 }
 0x22c   :  { %v575_v53 = vsel %vm572_vm7, %v574_v31, %v570_v45 }
 0x22d   :  { %v1055_v20 = vpop.eup %1054  ;;  %v1520_v62 = vmul.f32 %v1447_v48, %v575_v53  ;;  %v1523_v55 = vmul.f32 %v1449_v37, %v575_v53  ;;  %v1526_v26 = vmul.f32 %v1453_v2, %v575_v53  ;;  %v1529_v21 = vmul.f32 %v1456_v63, %v575_v53 }
 0x22e   :  { %v656_v46 = vmul.f32 %v1055_v20, %v642_v25  ;;  %v1541_v17 = vmul.f32 %v1459_v15, %v575_v53  ;;  %v581_v1 = vmul.f32 %v1465_v56, %v575_v53  ;;  %v1554_v15 = vmul.f32 %v1486_v19, %v575_v53 }
 0x22f   :  { %v597_v38 = vadd.f32 %v1523_v55, %v1520_v62  ;;  %v622_v4 = vmul.f32 %v1520_v62, %v1343_v10  ;;  %v623_v48 = vmul.f32 %v1523_v55, %v1347_v11  ;;  %v624_v2 = vmul.f32 %v1526_v26, %v1359_v18 }
 0x230   :  { %v658_v7 = vadd.f32 1.0, %v656_v46  ;;  %v625_v41 = vmul.f32 %v1529_v21, %v1370_v23  ;;  %v626_v3 = vmul.f32 %v1541_v17, %v1366_v22  ;;  %v1551_v18 = vmul.f32 %v1476_v43, %v575_v53 }
 0x231   :  { %v598_v37 = vadd.f32 %v597_v38, %v1526_v26  ;;  %v643_v57 = vadd.f32 %v623_v48, %v622_v4  ;;  %v627_v58 = vmul.f32 %v581_v1, %v1374_v24  ;;  %v664_v56 = vmul.f32 %v1463_v54, %v1277_v32 }
 0x232   :  { %1056 = vrcp.f32 %v658_v7  ;;  %v668_v43 = vmul.f32 %v1489_v12, %v1285_v39  ;;  %v669_v19 = vmul.f32 %v1496_v44, %v1287_v42  ;;  %v628_v24 = vmul.f32 %v1551_v18, %v1382_v28 }
 0x233   :  { %v599_v63 = vadd.f32 %v598_v37, %v1529_v21  ;;  %v644_v10 = vadd.f32 %v643_v57, %v624_v2  ;;  %v629_v33 = vmul.f32 %v1554_v15, %v1387_v30  ;;  %v667_v46 = vmul.f32 %v1479_v40, %v1283_v36 }
 0x234   :  { %v676_v34 = vmul.f32 %v1541_v17, %v1333_v0  ;;  %v677_v36 = vmul.f32 %v581_v1, %v1339_v8  ;;  %v672_v40 = vmul.f32 %v1520_v62, %v1622_v35  ;;  %v1626_v62 = vld [vmem:[#allocation19_spill] sm:$0xff] }
 0x235   :  { %v645_v11 = vadd.f32 %v644_v10, %v625_v41  ;;  %v600_v61 = vadd.f32 %v599_v63, %v1541_v17 }
 0x237   :  { %v601_v47 = vadd.f32 %v600_v61, %v581_v1  ;;  %v646_v9 = vadd.f32 %v645_v11, %v626_v3 }
 0x238   :  { %v1057_v23 = vpop.eup %1056 }
 0x239   :  { %v662_v14 = vsub.f32 0.0, %v1057_v23  ;;  %v602_v22 = vadd.f32 %v601_v47, %v1551_v18  ;;  %v647_v6 = vadd.f32 %v646_v9, %v627_v58  ;;  %v1623_v47 = vld [vmem:[#allocation17_spill] sm:$0xff]  ;;  %v1624_v9 = vld [vmem:[#allocation18_spill] sm:$0xff] }
 0x23a   :  { %v673_v58 = vmul.f32 %v1523_v55, %v1623_v47  ;;  %v674_v23 = vmul.f32 %v1526_v26, %v1624_v9  ;;  %v1627_v55 = vld [vmem:[#allocation21_spill] sm:$0xff] }
 0x23b   :  { %v680_v32 = vmul.f32 %v664_v56, %v662_v14  ;;  %v681_v54 = vmul.f32 %v665_v49, %v662_v14  ;;  %v684_v51 = vmul.f32 %v668_v43, %v662_v14  ;;  %v685_v27 = vmul.f32 %v669_v19, %v662_v14  ;;  %v1625_v56 = vld [vmem:[#allocation20_spill] sm:$0xff] }
 0x23c   :  { %v603_v39 = vadd.f32 %v602_v22, %v1554_v15  ;;  %v648_v12 = vadd.f32 %v647_v6, %v628_v24  ;;  %v686_v44 = vmul.f32 %v670_v16, %v662_v14  ;;  %v687_v5 = vmul.f32 %v671_v29, %v662_v14 }
 0x23d   :  { %v696_v42 = vpack.c.bf16 %v681_v54, %v680_v32  ;;  %v698_v28 = vpack.c.bf16 %v685_v27, %v684_v51  ;;  %v682_v4 = vmul.f32 %v666_v60, %v662_v14  ;;  %v683_v48 = vmul.f32 %v667_v46, %v662_v14  ;;  %v1013_v54 = vld [vmem:[%s1608_s5] ss:$0 sm:$0xff]  ;;  %s1223_s5 = smov [#allocation11]  }
 0x23e   :  { %v604_v52 = vrot.slane %v603_v39, 4  ;;  %v649_v31 = vadd.f32 %v648_v12, %v629_v33  ;;  %v699_v50 = vpack.c.bf16 %v687_v5, %v686_v44  ;;  %v675_v14 = vmul.f32 %v1529_v21, %v1625_v56  ;;  %s841_s23 = sshll.u32 %s1223_s5, 4  ;;  %s842_s23 = int_to_ptr.vmem [resolvable:$true] %s841_s23 }
 0x23f   :  { %780 = vmatmul.bf16.vlgmr.msra.gmra.mxu2 %v696_v42  ;;  %v697_v2 = vpack.c.bf16 %v683_v48, %v682_v4  ;;  %v678_v24 = vmul.f32 %v1551_v18, %v1626_v62  ;;  %v679_v16 = vmul.f32 %v1554_v15, %v1627_v55 }
 0x240   :  { %v605_v13 = vadd.f32 %v604_v52, %v603_v39  ;;  %v650_v45 = vrot.slane %v649_v31, 4 }
 0x242   :  { %v606_v53 = vrot.slane %v605_v13, 2  ;;  %v651_v30 = vadd.f32 %v650_v45, %v649_v31 }
 0x244   :  { %v607_v25 = vadd.f32 %v606_v53, %v605_v13  ;;  %v652_v20 = vrot.slane %v651_v30, 2 }
 0x246   :  { %v608_v59 = vrot.slane %v607_v25, 1  ;;  %v653_v7 = vadd.f32 %v652_v20, %v651_v30 }
 0x248   :  { %v609_v38 = vadd.f32 %v608_v59, %v607_v25  ;;  %v654_v57 = vrot.slane %v653_v7, 1 }
 0x24a   :  { %v611_v37 = vadd.f32 1e-08, %v609_v38  ;;  %v655_v63 = vadd.f32 %v654_v57, %v653_v7 }
 0x24c   :  { %1058 = vrcp.f32 %v611_v37 }
 0x24f   :  { %785 = vmatmul.bf16.gmra.mxu2 %v697_v2 }
 0x252   :  { %v1059_v41 = vpop.eup %1058 }
 0x253   :  { %v657_v10 = vmul.f32 %v1059_v41, %v655_v63 }
 0x255   :  { %v659_v11 = vadd.f32 1.0, %v657_v10 }
 0x257   :  { %1060 = vrcp.f32 %v659_v11 }
 0x25d   :  { %v1061_v61 = vpop.eup %1060 }
 0x25e   :  { %v663_v3 = vsub.f32 0.0, %v1061_v61 }
 0x25f   :  { %790 = vmatmul.bf16.gmra.mxu2 %v698_v28 }
 0x260   :  { %v692_v49 = vmul.f32 %v676_v34, %v663_v3  ;;  %v693_v22 = vmul.f32 %v677_v36, %v663_v3  ;;  %v688_v6 = vmul.f32 %v672_v40, %v663_v3  ;;  %v689_v43 = vmul.f32 %v673_v58, %v663_v3 }
 0x261   :  { %v690_v0 = vmul.f32 %v674_v23, %v663_v3  ;;  %v691_v17 = vmul.f32 %v675_v14, %v663_v3  ;;  %v694_v26 = vmul.f32 %v678_v24, %v663_v3  ;;  %v695_v32 = vmul.f32 %v679_v16, %v663_v3 }
 0x262   :  { %v702_v8 = vpack.c.bf16 %v693_v22, %v692_v49  ;;  %v700_v1 = vpack.c.bf16 %v689_v43, %v688_v6 }
 0x263   :  { %v701_v19 = vpack.c.bf16 %v691_v17, %v690_v0  ;;  %v703_v21 = vpack.c.bf16 %v695_v32, %v694_v26 }
 0x264   :  { %810 = vmatmul.bf16.vlgmr.msra.gmra.mxu3 %v702_v8 }
 0x26f   :  { %795 = vmatmul.bf16.gmra.mxu2 %v699_v50 }
 0x274   :  { %815 = vmatmul.bf16.gmra.mxu3 %v703_v21 }
 0x27f   :  { %800 = vmatmul.bf16.gmra.mxu2 %v700_v1 }
 0x28f   :  { %805 = vmatmul.bf16.gmra.mxu2 %v701_v19 }
 0x2c2   :  { %v781_v33 = vpop.f32.mrf.mxu2 }
 0x2c3   :  { %v782_v29 = vadd.f32 %v1013_v54, %v781_v33 }
 0x2c5   :  { %821 = vst [vmem:[#allocation11] sm:$0xff] %v782_v29 }
 0x2ca   :  { %v783_v51 = vpop.f32.mrf.mxu2 }
 0x2cb   :  { %v784_v27 = vadd.f32 %v1013_v54, %v783_v51 }
 0x2cd   :  { %822 = vst [vmem:[#allocation11 + $0x8] sm:$0xff] %v784_v27 }
 0x2d2   :  { %v786_v18 = vpop.f32.mrf.mxu2 }
 0x2d3   :  { %v787_v39 = vadd.f32 %v1013_v54, %v786_v18 }
 0x2d5   :  { %823 = vst [vmem:[#allocation11 + $0x10] sm:$0xff] %v787_v39 }
 0x2da   :  { %v788_v15 = vpop.f32.mrf.mxu2 }
 0x2db   :  { %v789_v12 = vadd.f32 %v1013_v54, %v788_v15 }
 0x2dd   :  { %824 = vst [vmem:[#allocation11 + $0x18] sm:$0xff] %v789_v12 }
 0x2e2   :  { %v791_v42 = vpop.f32.mrf.mxu2 }
 0x2e3   :  { %v792_v44 = vadd.f32 %v1013_v54, %v791_v42 }
 0x2e5   :  { %825 = vst [vmem:[#allocation11 + $0x20] sm:$0xff] %v792_v44 }
 0x2e7   :  { %v811_v5 = vpop.f32.mrf.mxu3 }
 0x2e8   :  { %v812_v28 = vadd.f32 %v1013_v54, %v811_v5 }
 0x2ea   :  { %833 = vst [vmem:[#allocation11 + $0x60] sm:$0xff] %v812_v28  ;;  %v793_v52 = vpop.f32.mrf.mxu2 }
 0x2eb   :  { %v794_v31 = vadd.f32 %v1013_v54, %v793_v52 }
 0x2ed   :  { %826 = vst [vmem:[#allocation11 + $0x28] sm:$0xff] %v794_v31 }
 0x2ef   :  { %v813_v50 = vpop.f32.mrf.mxu3 }
 0x2f0   :  { %v814_v13 = vadd.f32 %v1013_v54, %v813_v50 }
 0x2f2   :  { %834 = vst [vmem:[#allocation11 + $0x68] sm:$0xff] %v814_v13  ;;  %v796_v45 = vpop.f32.mrf.mxu2 }
 0x2f3   :  { %v797_v53 = vadd.f32 %v1013_v54, %v796_v45 }
 0x2f5   :  { %827 = vst [vmem:[#allocation11 + $0x30] sm:$0xff] %v797_v53 }
 0x2f7   :  { %v816_v30 = vpop.f32.mrf.mxu3 }
 0x2f8   :  { %v817_v25 = vadd.f32 %v1013_v54, %v816_v30 }
 0x2fa   :  { %835 = vst [vmem:[#allocation11 + $0x70] sm:$0xff] %v817_v25  ;;  %v798_v20 = vpop.f32.mrf.mxu2 }
 0x2fb   :  { %v799_v59 = vadd.f32 %v1013_v54, %v798_v20 }
 0x2fd   :  { %828 = vst [vmem:[#allocation11 + $0x38] sm:$0xff] %v799_v59 }
 0x2ff   :  { %v818_v60 = vpop.f32.mrf.mxu3 }
 0x300   :  { %v819_v46 = vadd.f32 %v1013_v54, %v818_v60 }
 0x302   :  { %836 = vst [vmem:[#allocation11 + $0x78] sm:$0xff] %v819_v46  ;;  %v801_v38 = vpop.f32.mrf.mxu2 }
 0x303   :  { %v802_v4 = vadd.f32 %v1013_v54, %v801_v38 }
 0x305   :  { %829 = vst [vmem:[#allocation11 + $0x40] sm:$0xff] %v802_v4 }
 0x30a   :  { %v803_v48 = vpop.f32.mrf.mxu2 }
 0x30b   :  { %v804_v7 = vadd.f32 %v1013_v54, %v803_v48 }
 0x30d   :  { %830 = vst [vmem:[#allocation11 + $0x48] sm:$0xff] %v804_v7 }
 0x312   :  { %v806_v37 = vpop.f32.mrf.mxu2 }
 0x313   :  { %v807_v2 = vadd.f32 %v1013_v54, %v806_v37 }
 0x315   :  { %831 = vst [vmem:[#allocation11 + $0x50] sm:$0xff] %v807_v2 }
 0x31a   :  { %v808_v57 = vpop.f32.mrf.mxu2 }
 0x31b   :  { %v809_v63 = vadd.f32 %v1013_v54, %v808_v57 }
 0x31d   :  { %832 = vst [vmem:[#allocation11 + $0x58] sm:$0xff] %v809_v63 }
 0x31e   :  { %849 = dma.vmem_to_hbm [thread:$0]  %s842_s23, 2048, %s844_s28, [#allocation4], %s1215_s26, %s1215_s26, %s1216_s27  }
 0x31f   :  { %1212 = dma.done.wait [#allocation4], 2048  }
 0x320   :  { %1213 = vsyncadd [#allocation4], 4294965248 }
 0x321   :  { %854 = vsyncpa [#allocation3], 1 }
 0x322   :  { %855 = vsyncpa [#allocation6], 1 }
 0x323   :  { %856 = vsyncpa [#allocation9], 1 }
 0x324   :  { %857 = vsyncpa [#allocation4], 1 }

// kernel: tpu_custom_call.1
= control target key start
LH: loop header
LB: loop body
LE: loop exit
PB: predicated region body
PF: predicated region fallthrough
CT: control target
= control target key end

     0   :  { %11 = vsyncpa [#allocation3], 0  ;;  %s1603_s0 = inlined_call_operand.hbm [shape: f32[1,128], index: 0, kind: input, shape index: {}]   ;;  %s1604_s1 = inlined_call_operand.hbm [shape: f32[2,64,128], index: 1, kind: input, shape index: {}]   ;;  %s1605_s2 = inlined_call_operand.hbm [shape: bf16[128,128], index: 2, kind: input, shape index: {}]   ;;  %s1606_s3 = inlined_call_operand.hbm [shape: bf16[128,128], index: 3, kind: input, shape index: {}]   ;;  %s1607_s4 = inlined_call_operand.hbm [shape: bf16[128,128], index: 4, kind: input, shape index: {}]   ;;  %s1608_s5 = inlined_call_operand.vmem [shape: f32[1,128], index: 5, kind: input, shape index: {}]   ;;  %s1609_s6 = inlined_call_operand.hbm [shape: f32[2,64,128], index: 6, kind: output, shape index: {}]  }
   0x1   :  { %12 = vsyncpa [#allocation6], 0 }
   0x2   :  { %13 = vsyncpa [#allocation9], 0  ;;  %s30_s23 = sshll.u32 %s1604_s1, 4  ;;  %s31_s23 = int_to_ptr.hbm [resolvable:$true] %s30_s23 }
   0x3   :  { %14 = vsyncpa [#allocation4], 0  ;;  %s1214_s24 = smov [#allocation5]   ;;  %s1215_s26 = smov 128  }
   0x4   :  { %s32_s25 = sshll.u32 %s1214_s24, 4  ;;  %s1216_s27 = smov 8   ;;  %s33_s25 = int_to_ptr.vmem [resolvable:$true] %s32_s25 }
   0x5   :  { %38 = dma.hbm_to_vmem [thread:$0]  %s31_s23, 2048, %s33_s25, [#allocation6], %s1215_s26, %s1215_s26, %s1216_s27  }
   0x6   :  { %s56_s30 = sshll.u32 %s1606_s3, 4  ;;  %s1217_s7 = smov [#allocation8]   ;;  %s57_s30 = int_to_ptr.hbm [resolvable:$true] %s56_s30 }
   0x7   :  { %s58_s8 = sshll.u32 %s1217_s7, 4  ;;  %s20_s10 = sshll.u32 %s1603_s0, 4  ;;  %s59_s8 = int_to_ptr.vmem [resolvable:$true] %s58_s8  ;;  %s21_s10 = int_to_ptr.hbm [resolvable:$true] %s20_s10 }
   0x8   :  { %s1218_s11 = smov 64   ;;  %s1219_s12 = smov 4  }
   0x9   :  { %64 = dma.hbm_to_vmem [thread:$0]  %s57_s30, 1024, %s59_s8, [#allocation9], %s1218_s11, %s1218_s11, %s1219_s12  }
   0xa   :  { %s43_s15 = sshll.u32 %s1605_s2, 4  ;;  %s1220_s16 = smov [#allocation2]   ;;  %s44_s15 = int_to_ptr.hbm [resolvable:$true] %s43_s15 }
   0xb   :  { %s22_s17 = sshll.u32 %s1220_s16, 4  ;;  %s1221_s3 = smov [#allocation7]   ;;  %s23_s17 = int_to_ptr.vmem [resolvable:$true] %s22_s17 }
   0xc   :  { %25 = dma.hbm_to_vmem [thread:$0]  %s21_s10, 16, %s23_s17, [#allocation3]  }
   0xd   :  { %s45_s18 = sshll.u32 %s1221_s3, 4  ;;  %s69_s0 = sshll.u32 %s1607_s4, 4  ;;  %s46_s18 = int_to_ptr.vmem [resolvable:$true] %s45_s18  ;;  %s70_s0 = int_to_ptr.hbm [resolvable:$true] %s69_s0 }
   0xe   :  { %51 = dma.hbm_to_vmem [thread:$0]  %s44_s15, 1024, %s46_s18, [#allocation6], %s1218_s11, %s1218_s11, %s1219_s12  }
   0xf   :  { %s1222_s21 = smov [#allocation10]  }
  0x10   :  { %s71_s22 = sshll.u32 %s1222_s21, 4  ;;  %s72_s22 = int_to_ptr.vmem [resolvable:$true] %s71_s22 }
  0x11   :  { %77 = dma.hbm_to_vmem [thread:$0]  %s70_s0, 1024, %s72_s22, [#allocation9], %s1218_s11, %s1218_s11, %s1219_s12  }
  0x12   :  { %1206 = dma.done.wait [#allocation3], 16  }
  0x13   :  { %1207 = vsyncadd [#allocation3], 4294967280 }
  0x14   :  { %1208 = dma.done.wait [#allocation6], 3072  }
  0x15   :  { %1209 = vsyncadd [#allocation6], 4294964224 }
  0x16   :  { %1210 = dma.done.wait [#allocation9], 2048  }
  0x17   :  { %1211 = vsyncadd [#allocation9], 4294965248  ;;  %v961_v0 = vld [vmem:[#allocation7 + $0x38] sm:$0xff]  ;;  %v960_v1 = vld [vmem:[#allocation7 + $0x30] sm:$0xff]  ;;  %s843_s28 = sshll.u32 %s1609_s6, 4  ;;  %s844_s28 = int_to_ptr.hbm [resolvable:$true] %s843_s28 }
  0x18   :  { %188 = vmatpush.bf16.msra.mxu0 %v961_v0  ;;  %978 = vmatpush.bf16.msra.mxu3 %v961_v0  ;;  %v959_v2 = vld [vmem:[#allocation7 + $0x28] sm:$0xff]  ;;  %v958_v3 = vld [vmem:[#allocation7 + $0x20] sm:$0xff]  ;;  %v957_v4 = vld [vmem:[#allocation7 + $0x18] sm:$0xff] }
  0x19   :  { %v956_v5 = vld [vmem:[#allocation7 + $0x10] sm:$0xff]  ;;  %v955_v6 = vld [vmem:[#allocation7 + $0x8] sm:$0xff]  ;;  %v954_v7 = vld [vmem:[#allocation7] sm:$0xff] }
  0x1a   :  { %v100_v8 = vld [vmem:[#allocation5] sm:$0xff]  ;;  %v101_v9 = vld [vmem:[#allocation5 + $0x8] sm:$0xff]  ;;  %v102_v11 = vld [vmem:[#allocation5 + $0x10] sm:$0xff] }
  0x1b   :  { %v116_v10 = vpack.c.bf16 %v101_v9, %v100_v8  ;;  %v103_v12 = vld [vmem:[#allocation5 + $0x18] sm:$0xff]  ;;  %v104_v14 = vld [vmem:[#allocation5 + $0x20] sm:$0xff]  ;;  %v105_v15 = vld [vmem:[#allocation5 + $0x28] sm:$0xff] }
  0x1c   :  { %189 = vmatpush.bf16.msra.mxu0 %v960_v1  ;;  %979 = vmatpush.bf16.msra.mxu3 %v960_v1  ;;  %v117_v13 = vpack.c.bf16 %v103_v12, %v102_v11  ;;  %v118_v16 = vpack.c.bf16 %v105_v15, %v104_v14  ;;  %v112_v17 = vld [vmem:[#allocation5 + $0x60] sm:$0xff]  ;;  %v113_v18 = vld [vmem:[#allocation5 + $0x68] sm:$0xff]  ;;  %v106_v20 = vld [vmem:[#allocation5 + $0x30] sm:$0xff] }
  0x1d   :  { %v122_v19 = vpack.c.bf16 %v113_v18, %v112_v17  ;;  %v107_v21 = vld [vmem:[#allocation5 + $0x38] sm:$0xff]  ;;  %v114_v23 = vld [vmem:[#allocation5 + $0x70] sm:$0xff]  ;;  %v108_v26 = vld [vmem:[#allocation5 + $0x40] sm:$0xff] }
  0x1e   :  { %v119_v22 = vpack.c.bf16 %v107_v21, %v106_v20  ;;  %v115_v24 = vld [vmem:[#allocation5 + $0x78] sm:$0xff]  ;;  %v109_v27 = vld [vmem:[#allocation5 + $0x48] sm:$0xff]  ;;  %v110_v29 = vld [vmem:[#allocation5 + $0x50] sm:$0xff] }
  0x1f   :  { %v123_v25 = vpack.c.bf16 %v115_v24, %v114_v23  ;;  %v120_v28 = vpack.c.bf16 %v109_v27, %v108_v26  ;;  %v111_v30 = vld [vmem:[#allocation5 + $0x58] sm:$0xff]  ;;  %v968_v37 = vld [vmem:[#allocation10 + $0x30] sm:$0xff]  ;;  %v967_v38 = vld [vmem:[#allocation10 + $0x28] sm:$0xff] }
  0x20   :  { %190 = vmatpush.bf16.msra.mxu0 %v959_v2  ;;  %980 = vmatpush.bf16.msra.mxu3 %v959_v2  ;;  %v121_v31 = vpack.c.bf16 %v111_v30, %v110_v29  ;;  %v969_v35 = vld [vmem:[#allocation10 + $0x38] sm:$0xff]  ;;  %v966_v40 = vld [vmem:[#allocation10 + $0x20] sm:$0xff]  ;;  %v964_v43 = vld [vmem:[#allocation10 + $0x10] sm:$0xff] }
  0x21   :  { %371 = vmatpush.bf16.msra.mxu1 %v969_v35  ;;  %v965_v41 = vld [vmem:[#allocation10 + $0x18] sm:$0xff]  ;;  %v963_v45 = vld [vmem:[#allocation10 + $0x8] sm:$0xff]  ;;  %v962_v53 = vld [vmem:[#allocation10] sm:$0xff] }
  0x24   :  { %191 = vmatpush.bf16.msra.mxu0 %v958_v3  ;;  %981 = vmatpush.bf16.msra.mxu3 %v958_v3 }
  0x25   :  { %372 = vmatpush.bf16.msra.mxu1 %v968_v37 }
  0x28   :  { %192 = vmatpush.bf16.msra.mxu0 %v957_v4  ;;  %982 = vmatpush.bf16.msra.mxu3 %v957_v4 }
  0x29   :  { %373 = vmatpush.bf16.msra.mxu1 %v967_v38 }
  0x2c   :  { %193 = vmatpush.bf16.msra.mxu0 %v956_v5  ;;  %983 = vmatpush.bf16.msra.mxu3 %v956_v5 }
  0x2d   :  { %374 = vmatpush.bf16.msra.mxu1 %v966_v40 }
  0x30   :  { %194 = vmatpush.bf16.msra.mxu0 %v955_v6  ;;  %984 = vmatpush.bf16.msra.mxu3 %v955_v6 }
  0x31   :  { %375 = vmatpush.bf16.msra.mxu1 %v965_v41 }
  0x34   :  { %195 = vmatpush.bf16.msra.mxu0 %v954_v7  ;;  %985 = vmatpush.bf16.msra.mxu3 %v954_v7 }
  0x35   :  { %376 = vmatpush.bf16.msra.mxu1 %v964_v43 }
  0x37   :  { %196 = vmatmul.bf16.vlgmr.msra.gmra.mxu0 %v116_v10  ;;  %226 = vmatmul.bf16.vlgmr.msra.gmra.mxu3 %v122_v19 }
  0x38   :  { %986 = vmatpush.bf16.msrb.mxu3 %v969_v35 }
  0x39   :  { %377 = vmatpush.bf16.msra.mxu1 %v963_v45 }
  0x3c   :  { %987 = vmatpush.bf16.msrb.mxu3 %v968_v37 }
  0x3d   :  { %378 = vmatpush.bf16.msra.mxu1 %v962_v53 }
  0x40   :  { %988 = vmatpush.bf16.msrb.mxu3 %v967_v38 }
  0x44   :  { %989 = vmatpush.bf16.msrb.mxu3 %v966_v40 }
  0x47   :  { %201 = vmatmul.bf16.gmra.mxu0 %v117_v13  ;;  %231 = vmatmul.bf16.gmra.mxu3 %v123_v25 }
  0x48   :  { %990 = vmatpush.bf16.msrb.mxu3 %v965_v41 }
  0x4c   :  { %991 = vmatpush.bf16.msrb.mxu3 %v964_v43 }
  0x50   :  { %992 = vmatpush.bf16.msrb.mxu3 %v963_v45 }
  0x54   :  { %993 = vmatpush.bf16.msrb.mxu3 %v962_v53 }
  0x57   :  { %206 = vmatmul.bf16.gmra.mxu0 %v118_v16 }
  0x67   :  { %211 = vmatmul.bf16.gmra.mxu0 %v119_v22 }
  0x77   :  { %216 = vmatmul.bf16.gmra.mxu0 %v120_v28 }
  0x87   :  { %221 = vmatmul.bf16.gmra.mxu0 %v121_v31 }
  0xb4   :  { %v1277_v32 = vpop.f32.mrf.mxu0 }
  0xb5   :  { %v1295_v46 = vmul.f32 %v1277_v32, %v1277_v32 }
  0xba   :  { %v1333_v0 = vpop.f32.mrf.mxu3 }
  0xbb   :  { %v1366_v22 = vmul.f32 %v1333_v0, %v1333_v0 }
  0xbc   :  { %v1279_v33 = vpop.f32.mrf.mxu0 }
  0xbd   :  { %v1291_v44 = vmul.f32 %v1279_v33, %v1279_v33 }
  0xbf   :  { %v253_v48 = vadd.f32 %v1291_v44, %v1295_v46 }
  0xc2   :  { %v1339_v8 = vpop.f32.mrf.mxu3 }
  0xc3   :  { %v1374_v24 = vmul.f32 %v1339_v8, %v1339_v8 }
  0xc4   :  { %v1281_v34 = vpop.f32.mrf.mxu0 }
  0xc5   :  { %v1299_v47 = vmul.f32 %v1281_v34, %v1281_v34 }
  0xc7   :  { %v254_v51 = vadd.f32 %v253_v48, %v1299_v47 }
  0xca   :  { %v1353_v16 = vpop.f32.mrf.mxu3 }
  0xcb   :  { %1619 = vst [vmem:[#allocation19_spill] sm:$0xff] %v1353_v16  ;;  %v1382_v28 = vmul.f32 %v1353_v16, %v1353_v16 }
  0xcc   :  { %v1283_v36 = vpop.f32.mrf.mxu0 }
  0xcd   :  { %v1305_v49 = vmul.f32 %v1283_v36, %v1283_v36 }
  0xcf   :  { %v255_v54 = vadd.f32 %v254_v51, %v1305_v49 }
  0xd2   :  { %v1377_v26 = vpop.f32.mrf.mxu3 }
  0xd3   :  { %1621 = vst [vmem:[#allocation21_spill] sm:$0xff] %v1377_v26  ;;  %v1387_v30 = vmul.f32 %v1377_v26, %v1377_v26 }
  0xd4   :  { %v1285_v39 = vpop.f32.mrf.mxu0 }
  0xd5   :  { %v1312_v52 = vmul.f32 %v1285_v39, %v1285_v39 }
  0xd7   :  { %v256_v56 = vadd.f32 %v255_v54, %v1312_v52 }
  0xdc   :  { %v1287_v42 = vpop.f32.mrf.mxu0 }
  0xdd   :  { %v1317_v55 = vmul.f32 %v1287_v42, %v1287_v42 }
  0xdf   :  { %v257_v58 = vadd.f32 %v256_v56, %v1317_v55 }
  0xe4   :  { %v1307_v50 = vpop.f32.mrf.mxu0 }
  0xe5   :  { %v1322_v57 = vmul.f32 %v1307_v50, %v1307_v50 }
  0xe7   :  { %v258_v60 = vadd.f32 %v257_v58, %v1322_v57 }
  0xec   :  { %v1325_v59 = vpop.f32.mrf.mxu0 }
  0xed   :  { %v1330_v61 = vmul.f32 %v1325_v59, %v1325_v59 }
  0xef   :  { %v259_v62 = vadd.f32 %v258_v60, %v1330_v61 }
  0xf1   :  { %v260_v63 = vrot.slane %v259_v62, 4 }
  0xf3   :  { %v261_v1 = vadd.f32 %v260_v63, %v259_v62 }
  0xf4   :  { %v1335_v2 = vpop.f32.mrf.mxu0 }
  0xf5   :  { %1616 = vst [vmem:[#allocation16_spill] sm:$0xff] %v1335_v2  ;;  %v262_v3 = vrot.slane %v261_v1, 2  ;;  %v1343_v10 = vmul.f32 %v1335_v2, %v1335_v2 }
  0xf7   :  { %v263_v4 = vadd.f32 %v262_v3, %v261_v1 }
  0xf9   :  { %v264_v5 = vrot.slane %v263_v4, 1 }
  0xfb   :  { %v265_v6 = vadd.f32 %v264_v5, %v263_v4 }
  0xfc   :  { %v1337_v7 = vpop.f32.mrf.mxu0 }
  0xfd   :  { %1617 = vst [vmem:[#allocation17_spill] sm:$0xff] %v1337_v7  ;;  %v279_v9 = vmax.f32 %v265_v6, 1e-24  ;;  %v1347_v11 = vmul.f32 %v1337_v7, %v1337_v7 }
  0xff   :  { %1014 = vrcp.f32 %v279_v9  ;;  %v266_v17 = vadd.f32 %v1347_v11, %v1343_v10 }
 0x104   :  { %v1349_v12 = vpop.f32.mrf.mxu0 }
 0x105   :  { %1618 = vst [vmem:[#allocation18_spill] sm:$0xff] %v1349_v12  ;;  %v1015_v13 = vpop.eup %1014  ;;  %v1359_v18 = vmul.f32 %v1349_v12, %v1349_v12 }
 0x106   :  { %v283_v14 = vmul.f32 %v1015_v13, %v1295_v46  ;;  %v284_v15 = vmul.f32 %v1015_v13, %v1291_v44  ;;  %v285_v31 = vmul.f32 %v1015_v13, %v1299_v47  ;;  %v286_v35 = vmul.f32 %v1015_v13, %v1305_v49 }
 0x107   :  { %v267_v20 = vadd.f32 %v266_v17, %v1359_v18  ;;  %v287_v54 = vmul.f32 %v1015_v13, %v1312_v52  ;;  %v288_v56 = vmul.f32 %v1015_v13, %v1317_v55  ;;  %v289_v4 = vmul.f32 %v1015_v13, %v1322_v57 }
 0x108   :  { %v299_v19 = vpack.c.bf16 %v284_v15, %v283_v14  ;;  %v300_v40 = vpack.c.bf16 %v286_v35, %v285_v31  ;;  %v290_v5 = vmul.f32 %v1015_v13, %v1330_v61 }
 0x109   :  { %v301_v60 = vpack.c.bf16 %v288_v56, %v287_v54 }
 0x10a   :  { %379 = vmatmul.bf16.vlgmr.msra.gmra.mxu1 %v299_v19  ;;  %v302_v6 = vpack.c.bf16 %v290_v5, %v289_v4 }
 0x10c   :  { %v1362_v21 = vpop.f32.mrf.mxu0 }
 0x10d   :  { %1620 = vst [vmem:[#allocation20_spill] sm:$0xff] %v1362_v21  ;;  %v1370_v23 = vmul.f32 %v1362_v21, %v1362_v21 }
 0x10f   :  { %v268_v25 = vadd.f32 %v267_v20, %v1370_v23 }
 0x111   :  { %v269_v27 = vadd.f32 %v268_v25, %v1366_v22 }
 0x113   :  { %v270_v29 = vadd.f32 %v269_v27, %v1374_v24 }
 0x115   :  { %v271_v37 = vadd.f32 %v270_v29, %v1382_v28 }
 0x117   :  { %v272_v38 = vadd.f32 %v271_v37, %v1387_v30 }
 0x119   :  { %v273_v41 = vrot.slane %v272_v38, 4 }
 0x11a   :  { %384 = vmatmul.bf16.gmra.mxu1 %v300_v40 }
 0x11b   :  { %v274_v43 = vadd.f32 %v273_v41, %v272_v38 }
 0x11d   :  { %v275_v45 = vrot.slane %v274_v43, 2 }
 0x11f   :  { %v276_v48 = vadd.f32 %v275_v45, %v274_v43  ;;  %v1405_v43 = vld [vmem:[#allocation2] ss:$0 sm:$0xff] }
 0x121   :  { %v277_v51 = vrot.slane %v276_v48, 1 }
 0x123   :  { %v278_v53 = vadd.f32 %v277_v51, %v276_v48 }
 0x125   :  { %v280_v58 = vmax.f32 %v278_v53, 1e-24 }
 0x127   :  { %1016 = vrcp.f32 %v280_v58 }
 0x12a   :  { %389 = vmatmul.bf16.gmra.mxu1 %v301_v60 }
 0x12d   :  { %v1017_v62 = vpop.eup %1016 }
 0x12e   :  { %v295_v63 = vmul.f32 %v1017_v62, %v1366_v22  ;;  %v296_v1 = vmul.f32 %v1017_v62, %v1374_v24  ;;  %v297_v9 = vmul.f32 %v1017_v62, %v1382_v28  ;;  %v298_v14 = vmul.f32 %v1017_v62, %v1387_v30 }
 0x12f   :  { %v291_v17 = vmul.f32 %v1017_v62, %v1343_v10  ;;  %v292_v19 = vmul.f32 %v1017_v62, %v1347_v11  ;;  %v293_v25 = vmul.f32 %v1017_v62, %v1359_v18  ;;  %v294_v27 = vmul.f32 %v1017_v62, %v1370_v23 }
 0x130   :  { %v305_v3 = vpack.c.bf16 %v296_v1, %v295_v63  ;;  %v306_v15 = vpack.c.bf16 %v298_v14, %v297_v9 }
 0x131   :  { %v303_v20 = vpack.c.bf16 %v292_v19, %v291_v17  ;;  %v304_v29 = vpack.c.bf16 %v294_v27, %v293_v25 }
 0x132   :  { %409 = vmatmul.bf16.vlgmr.msrb.gmra.mxu3 %v305_v3 }
 0x13a   :  { %394 = vmatmul.bf16.gmra.mxu1 %v302_v6 }
 0x142   :  { %414 = vmatmul.bf16.gmra.mxu3 %v306_v15 }
 0x14a   :  { %399 = vmatmul.bf16.gmra.mxu1 %v303_v20 }
 0x15a   :  { %404 = vmatmul.bf16.gmra.mxu1 %v304_v29 }
 0x187   :  { %v380_v13 = vpop.f32.mrf.mxu1 }
 0x188   :  { %v424_v51 = vmul.f32 %v1405_v43, %v380_v13 }
 0x18f   :  { %v382_v31 = vpop.f32.mrf.mxu1 }
 0x190   :  { %v425_v53 = vmul.f32 %v1405_v43, %v382_v31 }
 0x197   :  { %v385_v35 = vpop.f32.mrf.mxu1 }
 0x198   :  { %v426_v45 = vmul.f32 %v1405_v43, %v385_v35 }
 0x19a   :  { %v440_v58 = vmax.f32 %v424_v51, %v426_v45 }
 0x19f   :  { %v387_v37 = vpop.f32.mrf.mxu1 }
 0x1a0   :  { %v427_v48 = vmul.f32 %v1405_v43, %v387_v37 }
 0x1a2   :  { %v441_v60 = vmax.f32 %v425_v53, %v427_v48 }
 0x1a7   :  { %v390_v38 = vpop.f32.mrf.mxu1 }
 0x1a8   :  { %v428_v54 = vmul.f32 %v1405_v43, %v390_v38 }
 0x1aa   :  { %v442_v1 = vmax.f32 %v440_v58, %v428_v54 }
 0x1af   :  { %v392_v40 = vpop.f32.mrf.mxu1 }
 0x1b0   :  { %v429_v56 = vmul.f32 %v1405_v43, %v392_v40 }
 0x1b2   :  { %v443_v3 = vmax.f32 %v441_v60, %v429_v56 }
 0x1b5   :  { %v410_v9 = vpop.f32.mrf.mxu3 }
 0x1b7   :  { %v395_v41 = vpop.f32.mrf.mxu1 }
 0x1b8   :  { %v430_v62 = vmul.f32 %v1405_v43, %v395_v41 }
 0x1ba   :  { %v444_v5 = vmax.f32 %v442_v1, %v430_v62 }
 0x1bd   :  { %v412_v27 = vpop.f32.mrf.mxu3 }
 0x1bf   :  { %v397_v63 = vpop.f32.mrf.mxu1 }
 0x1c0   :  { %v431_v4 = vmul.f32 %v1405_v43, %v397_v63 }
 0x1c2   :  { %v445_v6 = vmax.f32 %v443_v3, %v431_v4 }
 0x1c4   :  { %v446_v14 = vmax.f32 %v444_v5, %v445_v6 }
 0x1c5   :  { %v415_v5 = vpop.f32.mrf.mxu3 }
 0x1c6   :  { %v447_v15 = vrot.slane %v446_v14, 4 }
 0x1c7   :  { %v400_v17 = vpop.f32.mrf.mxu1 }
 0x1c8   :  { %v448_v19 = vmax.f32 %v446_v14, %v447_v15 }
 0x1ca   :  { %v449_v20 = vrot.slane %v448_v19, 2 }
 0x1cc   :  { %v450_v25 = vmax.f32 %v448_v19, %v449_v20 }
 0x1ce   :  { %v451_v29 = vrot.slane %v450_v25, 1 }
 0x1cf   :  { %v402_v13 = vpop.f32.mrf.mxu1 }
 0x1d0   :  { %v452_v31 = vmax.f32 %v450_v25, %v451_v29 }
 0x1d2   :  { %v466_v35 = vsub.f32 %v424_v51, %v452_v31  ;;  %v467_v37 = vsub.f32 %v425_v53, %v452_v31  ;;  %v468_v38 = vsub.f32 %v426_v45, %v452_v31  ;;  %v469_v40 = vsub.f32 %v427_v48, %v452_v31 }
 0x1d3   :  { %v470_v60 = vsub.f32 %v428_v54, %v452_v31  ;;  %v471_v1 = vsub.f32 %v429_v56, %v452_v31  ;;  %v472_v14 = vsub.f32 %v430_v62, %v452_v31  ;;  %v473_v20 = vsub.f32 %v431_v4, %v452_v31 }
 0x1d4   :  { %v482_v41 = vmul.f32 1.442695, %v466_v35  ;;  %v484_v58 = vmul.f32 1.442695, %v467_v37  ;;  %v486_v63 = vmul.f32 1.442695, %v468_v38  ;;  %v432_v48 = vmul.f32 %v1405_v43, %v400_v17 }
 0x1d5   :  { %v488_v3 = vmul.f32 1.442695, %v469_v40  ;;  %v490_v15 = vmul.f32 1.442695, %v470_v60  ;;  %v492_v51 = vmul.f32 1.442695, %v471_v1  ;;  %v436_v4 = vmul.f32 %v1405_v43, %v410_v9  ;;  %v417_v40 = vpop.f32.mrf.mxu3 }
 0x1d6   :  { %1018 = vpow2.f32 %v482_v41  ;;  %v494_v54 = vmul.f32 1.442695, %v472_v14  ;;  %v496_v29 = vmul.f32 1.442695, %v473_v20  ;;  %v433_v37 = vmul.f32 %v1405_v43, %v402_v13 }
 0x1d7   :  { %1020 = vpow2.f32 %v484_v58  ;;  %v405_v6 = vpop.f32.mrf.mxu1  ;;  %v437_v41 = vmul.f32 %v1405_v43, %v412_v27  ;;  %v439_v13 = vmul.f32 %v1405_v43, %v417_v40 }
 0x1d8   :  { %1022 = vpow2.f32 %v486_v63  ;;  %v434_v19 = vmul.f32 %v1405_v43, %v405_v6 }
 0x1d9   :  { %1024 = vpow2.f32 %v488_v3  ;;  %v438_v3 = vmul.f32 %v1405_v43, %v415_v5 }
 0x1da   :  { %1026 = vpow2.f32 %v490_v15  ;;  %v453_v25 = vmax.f32 %v432_v48, %v434_v19 }
 0x1db   :  { %1028 = vpow2.f32 %v492_v51 }
 0x1dc   :  { %v1416_v45 = vpop.eup %1018  ;;  %1030 = vpow2.f32 %v494_v54  ;;  %v455_v60 = vmax.f32 %v453_v25, %v436_v4 }
 0x1dd   :  { %v1419_v53 = vpop.eup %1020  ;;  %1032 = vpow2.f32 %v496_v29 }
 0x1de   :  { %v514_v56 = vadd.f32 %v1419_v53, %v1416_v45  ;;  %v1423_v62 = vpop.eup %1022  ;;  %v457_v20 = vmax.f32 %v455_v60, %v438_v3 }
 0x1df   :  { %v407_v35 = vpop.f32.mrf.mxu1  ;;  %v1429_v38 = vpop.eup %1024 }
 0x1e0   :  { %v515_v31 = vadd.f32 %v1423_v62, %v514_v56  ;;  %v435_v17 = vmul.f32 %v1405_v43, %v407_v35  ;;  %v1433_v1 = vpop.eup %1026 }
 0x1e1   :  { %v1438_v14 = vpop.eup %1028 }
 0x1e2   :  { %v516_v58 = vadd.f32 %v1429_v38, %v515_v31  ;;  %v454_v63 = vmax.f32 %v433_v37, %v435_v17  ;;  %v1441_v51 = vpop.eup %1030 }
 0x1e3   :  { %v1444_v25 = vpop.eup %1032 }
 0x1e4   :  { %v517_v9 = vadd.f32 %v1433_v1, %v516_v58  ;;  %v456_v6 = vmax.f32 %v454_v63, %v437_v41 }
 0x1e6   :  { %v518_v15 = vadd.f32 %v1438_v14, %v517_v9  ;;  %v458_v27 = vmax.f32 %v456_v6, %v439_v13 }
 0x1e8   :  { %v519_v54 = vadd.f32 %v1441_v51, %v518_v15  ;;  %v459_v56 = vmax.f32 %v457_v20, %v458_v27 }
 0x1ea   :  { %v520_v29 = vadd.f32 %v1444_v25, %v519_v54  ;;  %v460_v35 = vrot.slane %v459_v56, 4 }
 0x1ec   :  { %v521_v5 = vrot.slane %v520_v29, 4  ;;  %v461_v31 = vmax.f32 %v459_v56, %v460_v35 }
 0x1ee   :  { %v522_v43 = vadd.f32 %v521_v5, %v520_v29  ;;  %v462_v40 = vrot.slane %v461_v31, 2 }
 0x1f0   :  { %v523_v58 = vrot.slane %v522_v43, 2  ;;  %v463_v63 = vmax.f32 %v461_v31, %v462_v40 }
 0x1f2   :  { %v524_v26 = vadd.f32 %v523_v58, %v522_v43  ;;  %v464_v9 = vrot.slane %v463_v63, 1  ;;  %v977_v58 = vld [vmem:[#allocation8 + $0x38] sm:$0xff] }
 0x1f3   :  { %772 = vmatpush.bf16.msra.mxu2 %v977_v58  ;;  %994 = vmatpush.bf16.msra.mxu3 %v977_v58 }
 0x1f4   :  { %v525_v60 = vrot.slane %v524_v26, 1  ;;  %v465_v6 = vmax.f32 %v463_v63, %v464_v9 }
 0x1f6   :  { %v526_v16 = vadd.f32 %v525_v60, %v524_v26  ;;  %v474_v21 = vsub.f32 %v432_v48, %v465_v6  ;;  %v475_v12 = vsub.f32 %v433_v37, %v465_v6  ;;  %v476_v15 = vsub.f32 %v434_v19, %v465_v6 }
 0x1f7   :  { %v477_v20 = vsub.f32 %v435_v17, %v465_v6  ;;  %v478_v54 = vsub.f32 %v436_v4, %v465_v6  ;;  %v479_v56 = vsub.f32 %v437_v41, %v465_v6  ;;  %v480_v5 = vsub.f32 %v438_v3, %v465_v6 }
 0x1f8   :  { %1034 = vrcp.f32 %v526_v16  ;;  %v498_v27 = vmul.f32 1.442695, %v474_v21  ;;  %v500_v7 = vmul.f32 1.442695, %v475_v12  ;;  %v502_v2 = vmul.f32 1.442695, %v476_v15 }
 0x1f9   :  { %v504_v29 = vmul.f32 1.442695, %v477_v20  ;;  %v506_v31 = vmul.f32 1.442695, %v478_v54  ;;  %v481_v40 = vsub.f32 %v439_v13, %v465_v6  ;;  %v508_v26 = vmul.f32 1.442695, %v479_v56 }
 0x1fa   :  { %1036 = vpow2.f32 %v498_v27  ;;  %v551_v12 = vand.u32 2147483648, %v526_v16  ;;  %v510_v21 = vmul.f32 1.442695, %v480_v5  ;;  %vm545_vm1 = vweird.f32 %v526_v16  ;;  %v976_v27 = vld [vmem:[#allocation8 + $0x30] sm:$0xff] }
 0x1fb   :  { %1038 = vpow2.f32 %v500_v7  ;;  %v549_v7 = vand.u32 2147483647, %v526_v16  ;;  %v512_v41 = vmul.f32 1.442695, %v481_v40  ;;  %773 = vmatpush.bf16.msra.mxu2 %v976_v27  ;;  %995 = vmatpush.bf16.msra.mxu3 %v976_v27  ;;  %v973_v27 = vld [vmem:[#allocation8 + $0x18] sm:$0xff] }
 0x1fc   :  { %1040 = vpow2.f32 %v502_v2  ;;  %v552_v9 = vor.u32 1.1754944e-38, %v551_v12 }
 0x1fd   :  { %1042 = vpow2.f32 %v504_v29  ;;  %vm550_vm3 = vcmp.eq.f32.partialorder %v549_v7, 8.507059e+37 }
 0x1fe   :  { %v1035_v35 = vpop.eup %1034  ;;  %1044 = vpow2.f32 %v506_v31 }
 0x1ff   :  { %v541_v43 = vmul.f32 %v1035_v35, %v526_v16  ;;  %vm546_vm0 = vweird.f32 %v1035_v35  ;;  %1046 = vpow2.f32 %v508_v26  ;;  %v975_v26 = vld [vmem:[#allocation8 + $0x28] sm:$0xff] }
 0x200   :  { %v1447_v48 = vpop.eup %1036  ;;  %vm547_vm2 = vmor %vm545_vm1, %vm546_vm0  ;;  %1048 = vpow2.f32 %v510_v21  ;;  %774 = vmatpush.bf16.msra.mxu2 %v975_v26  ;;  %996 = vmatpush.bf16.msra.mxu3 %v975_v26 }
 0x201   :  { %v542_v19 = vsub.f32 1.0, %v541_v43  ;;  %v1449_v37 = vpop.eup %1038  ;;  %1050 = vpow2.f32 %v512_v41 }
 0x202   :  { %v527_v17 = vadd.f32 %v1449_v37, %v1447_v48  ;;  %v1453_v2 = vpop.eup %1040 }
 0x203   :  { %v543_v4 = vmul.f32 %v1035_v35, %v542_v19  ;;  %v1456_v63 = vpop.eup %1042 }
 0x204   :  { %v528_v13 = vadd.f32 %v1453_v2, %v527_v17  ;;  %v1459_v15 = vpop.eup %1044 }
 0x205   :  { %v544_v3 = vadd.f32 %v1035_v35, %v543_v4  ;;  %v1465_v56 = vpop.eup %1046 }
 0x206   :  { %v529_v6 = vadd.f32 %v1456_v63, %v528_v13  ;;  %v1476_v43 = vpop.eup %1048 }
 0x207   :  { %v548_v60 = vsel %vm547_vm2, %v1035_v35, %v544_v3  ;;  %v1486_v19 = vpop.eup %1050  ;;  %v974_v3 = vld [vmem:[#allocation8 + $0x20] sm:$0xff] }
 0x208   :  { %v553_v20 = vsel %vm550_vm3, %v552_v9, %v548_v60  ;;  %v530_v16 = vadd.f32 %v1459_v15, %v529_v6  ;;  %775 = vmatpush.bf16.msra.mxu2 %v974_v3  ;;  %997 = vmatpush.bf16.msra.mxu3 %v974_v3 }
 0x209   :  { %v1463_v54 = vmul.f32 %v1416_v45, %v553_v20  ;;  %v1468_v29 = vmul.f32 %v1419_v53, %v553_v20  ;;  %v1471_v35 = vmul.f32 %v1423_v62, %v553_v20  ;;  %v1479_v40 = vmul.f32 %v1429_v38, %v553_v20 }
 0x20a   :  { %v531_v5 = vadd.f32 %v1465_v56, %v530_v16  ;;  %v1489_v12 = vmul.f32 %v1433_v1, %v553_v20  ;;  %v1502_v13 = vmul.f32 %v1441_v51, %v553_v20  ;;  %v1508_v60 = vmul.f32 %v1444_v25, %v553_v20 }
 0x20b   :  { %v614_v31 = vmul.f32 %v1463_v54, %v1295_v46  ;;  %v584_v45 = vadd.f32 %v1468_v29, %v1463_v54  ;;  %v615_v53 = vmul.f32 %v1468_v29, %v1291_v44  ;;  %v616_v38 = vmul.f32 %v1471_v35, %v1299_v47 }
 0x20c   :  { %v532_v62 = vadd.f32 %v1476_v43, %v531_v5  ;;  %v1496_v44 = vmul.f32 %v1438_v14, %v553_v20  ;;  %v617_v17 = vmul.f32 %v1479_v40, %v1305_v49  ;;  %v618_v58 = vmul.f32 %v1489_v12, %v1312_v52  ;;  %776 = vmatpush.bf16.msra.mxu2 %v973_v27 }
 0x20d   :  { %v585_v46 = vadd.f32 %v584_v45, %v1471_v35  ;;  %v630_v21 = vadd.f32 %v615_v53, %v614_v31  ;;  %v620_v52 = vmul.f32 %v1502_v13, %v1322_v57  ;;  %v972_v53 = vld [vmem:[#allocation8 + $0x10] sm:$0xff]  ;;  %v621_v25 = vmul.f32 %v1508_v60, %v1330_v61  ;;  %998 = vmatpush.bf16.msra.mxu3 %v973_v27 }
 0x20e   :  { %v533_v4 = vadd.f32 %v1486_v19, %v532_v62  ;;  %v619_v6 = vmul.f32 %v1496_v44, %v1317_v55 }
 0x20f   :  { %v586_v7 = vadd.f32 %v585_v46, %v1479_v40  ;;  %v631_v41 = vadd.f32 %v630_v21, %v616_v38  ;;  %v971_v21 = vld [vmem:[#allocation8 + $0x8] sm:$0xff] }
 0x210   :  { %v534_v1 = vrot.slane %v533_v4, 4  ;;  %777 = vmatpush.bf16.msra.mxu2 %v972_v53 }
 0x211   :  { %v587_v47 = vadd.f32 %v586_v7, %v1489_v12  ;;  %v632_v9 = vadd.f32 %v631_v41, %v617_v17  ;;  %999 = vmatpush.bf16.msra.mxu3 %v972_v53  ;;  %v970_v41 = vld [vmem:[#allocation8] sm:$0xff] }
 0x212   :  { %v535_v14 = vadd.f32 %v534_v1, %v533_v4 }
 0x213   :  { %v588_v49 = vadd.f32 %v587_v47, %v1496_v44  ;;  %v633_v16 = vadd.f32 %v632_v9, %v618_v58 }
 0x214   :  { %v536_v51 = vrot.slane %v535_v14, 2  ;;  %778 = vmatpush.bf16.msra.mxu2 %v971_v21 }
 0x215   :  { %v589_v5 = vadd.f32 %v588_v49, %v1502_v13  ;;  %v634_v31 = vadd.f32 %v633_v16, %v619_v6  ;;  %1000 = vmatpush.bf16.msra.mxu3 %v971_v21 }
 0x216   :  { %v537_v45 = vadd.f32 %v536_v51, %v535_v14 }
 0x217   :  { %v590_v20 = vadd.f32 %v589_v5, %v1508_v60  ;;  %v635_v62 = vadd.f32 %v634_v31, %v620_v52 }
 0x218   :  { %v538_v55 = vrot.slane %v537_v45, 1  ;;  %779 = vmatpush.bf16.msra.mxu2 %v970_v41 }
 0x219   :  { %v591_v26 = vrot.slane %v590_v20, 4  ;;  %v636_v46 = vadd.f32 %v635_v62, %v621_v25  ;;  %1001 = vmatpush.bf16.msra.mxu3 %v970_v41 }
 0x21a   :  { %v539_v38 = vadd.f32 %v538_v55, %v537_v45 }
 0x21b   :  { %v592_v4 = vadd.f32 %v591_v26, %v590_v20  ;;  %v637_v7 = vrot.slane %v636_v46, 4 }
 0x21c   :  { %1052 = vrcp.f32 %v539_v38  ;;  %v573_v16 = vand.u32 2147483648, %v539_v38  ;;  %v571_v27 = vand.u32 2147483647, %v539_v38  ;;  %vm567_vm5 = vweird.f32 %v539_v38 }
 0x21d   :  { %v593_v57 = vrot.slane %v592_v4, 2  ;;  %v638_v17 = vadd.f32 %v637_v7, %v636_v46 }
 0x21e   :  { %v574_v31 = vor.u32 1.1754944e-38, %v573_v16  ;;  %vm572_vm7 = vcmp.eq.f32.partialorder %v571_v27, 8.507059e+37  ;;  %v670_v16 = vmul.f32 %v1502_v13, %v1307_v50 }
 0x21f   :  { %v594_v1 = vadd.f32 %v593_v57, %v592_v4  ;;  %v639_v61 = vrot.slane %v638_v17, 2 }
 0x221   :  { %v595_v3 = vrot.slane %v594_v1, 1  ;;  %v640_v14 = vadd.f32 %v639_v61, %v638_v17 }
 0x222   :  { %v1053_v47 = vpop.eup %1052 }
 0x223   :  { %v563_v58 = vmul.f32 %v1053_v47, %v539_v38  ;;  %v596_v9 = vadd.f32 %v595_v3, %v594_v1  ;;  %vm568_vm4 = vweird.f32 %v1053_v47  ;;  %v641_v5 = vrot.slane %v640_v14, 1 }
 0x224   :  { %vm569_vm6 = vmor %vm567_vm5, %vm568_vm4 }
 0x225   :  { %v564_v49 = vsub.f32 1.0, %v563_v58  ;;  %v610_v6 = vadd.f32 1e-08, %v596_v9  ;;  %v642_v25 = vadd.f32 %v641_v5, %v640_v14 }
 0x227   :  { %v565_v51 = vmul.f32 %v1053_v47, %v564_v49  ;;  %1054 = vrcp.f32 %v610_v6  ;;  %v665_v49 = vmul.f32 %v1468_v29, %v1279_v33  ;;  %v671_v29 = vmul.f32 %v1508_v60, %v1325_v59 }
 0x228   :  { %v666_v60 = vmul.f32 %v1471_v35, %v1281_v34  ;;  %v1622_v35 = vld [vmem:[#allocation16_spill] sm:$0xff] }
 0x229   :  { %v566_v52 = vadd.f32 %v1053_v47, %v565_v51 }
 0x22b   :  { %v570_v45 = vsel %vm569_vm6, %v1053_v47, %v566_v52 }
 0x22c   :  { %v575_v53 = vsel %vm572_vm7, %v574_v31, %v570_v45 }
 0x22d   :  { %v1055_v20 = vpop.eup %1054  ;;  %v1520_v62 = vmul.f32 %v1447_v48, %v575_v53  ;;  %v1523_v55 = vmul.f32 %v1449_v37, %v575_v53  ;;  %v1526_v26 = vmul.f32 %v1453_v2, %v575_v53  ;;  %v1529_v21 = vmul.f32 %v1456_v63, %v575_v53 }
 0x22e   :  { %v656_v46 = vmul.f32 %v1055_v20, %v642_v25  ;;  %v1541_v17 = vmul.f32 %v1459_v15, %v575_v53  ;;  %v581_v1 = vmul.f32 %v1465_v56, %v575_v53  ;;  %v1554_v15 = vmul.f32 %v1486_v19, %v575_v53 }
 0x22f   :  { %v597_v38 = vadd.f32 %v1523_v55, %v1520_v62  ;;  %v622_v4 = vmul.f32 %v1520_v62, %v1343_v10  ;;  %v623_v48 = vmul.f32 %v1523_v55, %v1347_v11  ;;  %v624_v2 = vmul.f32 %v1526_v26, %v1359_v18 }
 0x230   :  { %v658_v7 = vadd.f32 1.0, %v656_v46  ;;  %v625_v41 = vmul.f32 %v1529_v21, %v1370_v23  ;;  %v626_v3 = vmul.f32 %v1541_v17, %v1366_v22  ;;  %v1551_v18 = vmul.f32 %v1476_v43, %v575_v53 }
 0x231   :  { %v598_v37 = vadd.f32 %v597_v38, %v1526_v26  ;;  %v643_v57 = vadd.f32 %v623_v48, %v622_v4  ;;  %v627_v58 = vmul.f32 %v581_v1, %v1374_v24  ;;  %v664_v56 = vmul.f32 %v1463_v54, %v1277_v32 }
 0x232   :  { %1056 = vrcp.f32 %v658_v7  ;;  %v668_v43 = vmul.f32 %v1489_v12, %v1285_v39  ;;  %v669_v19 = vmul.f32 %v1496_v44, %v1287_v42  ;;  %v628_v24 = vmul.f32 %v1551_v18, %v1382_v28 }
 0x233   :  { %v599_v63 = vadd.f32 %v598_v37, %v1529_v21  ;;  %v644_v10 = vadd.f32 %v643_v57, %v624_v2  ;;  %v629_v33 = vmul.f32 %v1554_v15, %v1387_v30  ;;  %v667_v46 = vmul.f32 %v1479_v40, %v1283_v36 }
 0x234   :  { %v676_v34 = vmul.f32 %v1541_v17, %v1333_v0  ;;  %v677_v36 = vmul.f32 %v581_v1, %v1339_v8  ;;  %v672_v40 = vmul.f32 %v1520_v62, %v1622_v35  ;;  %v1626_v62 = vld [vmem:[#allocation19_spill] sm:$0xff] }
 0x235   :  { %v645_v11 = vadd.f32 %v644_v10, %v625_v41  ;;  %v600_v61 = vadd.f32 %v599_v63, %v1541_v17 }
 0x237   :  { %v601_v47 = vadd.f32 %v600_v61, %v581_v1  ;;  %v646_v9 = vadd.f32 %v645_v11, %v626_v3 }
 0x238   :  { %v1057_v23 = vpop.eup %1056 }
 0x239   :  { %v662_v14 = vsub.f32 0.0, %v1057_v23  ;;  %v602_v22 = vadd.f32 %v601_v47, %v1551_v18  ;;  %v647_v6 = vadd.f32 %v646_v9, %v627_v58  ;;  %v1623_v47 = vld [vmem:[#allocation17_spill] sm:$0xff]  ;;  %v1624_v9 = vld [vmem:[#allocation18_spill] sm:$0xff] }
 0x23a   :  { %v673_v58 = vmul.f32 %v1523_v55, %v1623_v47  ;;  %v674_v23 = vmul.f32 %v1526_v26, %v1624_v9  ;;  %v1627_v55 = vld [vmem:[#allocation21_spill] sm:$0xff] }
 0x23b   :  { %v680_v32 = vmul.f32 %v664_v56, %v662_v14  ;;  %v681_v54 = vmul.f32 %v665_v49, %v662_v14  ;;  %v684_v51 = vmul.f32 %v668_v43, %v662_v14  ;;  %v685_v27 = vmul.f32 %v669_v19, %v662_v14  ;;  %v1625_v56 = vld [vmem:[#allocation20_spill] sm:$0xff] }
 0x23c   :  { %v603_v39 = vadd.f32 %v602_v22, %v1554_v15  ;;  %v648_v12 = vadd.f32 %v647_v6, %v628_v24  ;;  %v686_v44 = vmul.f32 %v670_v16, %v662_v14  ;;  %v687_v5 = vmul.f32 %v671_v29, %v662_v14 }
 0x23d   :  { %v696_v42 = vpack.c.bf16 %v681_v54, %v680_v32  ;;  %v698_v28 = vpack.c.bf16 %v685_v27, %v684_v51  ;;  %v682_v4 = vmul.f32 %v666_v60, %v662_v14  ;;  %v683_v48 = vmul.f32 %v667_v46, %v662_v14  ;;  %v1013_v54 = vld [vmem:[%s1608_s5] ss:$0 sm:$0xff]  ;;  %s1223_s5 = smov [#allocation11]  }
 0x23e   :  { %v604_v52 = vrot.slane %v603_v39, 4  ;;  %v649_v31 = vadd.f32 %v648_v12, %v629_v33  ;;  %v699_v50 = vpack.c.bf16 %v687_v5, %v686_v44  ;;  %v675_v14 = vmul.f32 %v1529_v21, %v1625_v56  ;;  %s841_s23 = sshll.u32 %s1223_s5, 4  ;;  %s842_s23 = int_to_ptr.vmem [resolvable:$true] %s841_s23 }
 0x23f   :  { %780 = vmatmul.bf16.vlgmr.msra.gmra.mxu2 %v696_v42  ;;  %v697_v2 = vpack.c.bf16 %v683_v48, %v682_v4  ;;  %v678_v24 = vmul.f32 %v1551_v18, %v1626_v62  ;;  %v679_v16 = vmul.f32 %v1554_v15, %v1627_v55 }
 0x240   :  { %v605_v13 = vadd.f32 %v604_v52, %v603_v39  ;;  %v650_v45 = vrot.slane %v649_v31, 4 }
 0x242   :  { %v606_v53 = vrot.slane %v605_v13, 2  ;;  %v651_v30 = vadd.f32 %v650_v45, %v649_v31 }
 0x244   :  { %v607_v25 = vadd.f32 %v606_v53, %v605_v13  ;;  %v652_v20 = vrot.slane %v651_v30, 2 }
 0x246   :  { %v608_v59 = vrot.slane %v607_v25, 1  ;;  %v653_v7 = vadd.f32 %v652_v20, %v651_v30 }
 0x248   :  { %v609_v38 = vadd.f32 %v608_v59, %v607_v25  ;;  %v654_v57 = vrot.slane %v653_v7, 1 }
 0x24a   :  { %v611_v37 = vadd.f32 1e-08, %v609_v38  ;;  %v655_v63 = vadd.f32 %v654_v57, %v653_v7 }
 0x24c   :  { %1058 = vrcp.f32 %v611_v37 }
 0x24f   :  { %785 = vmatmul.bf16.gmra.mxu2 %v697_v2 }
 0x252   :  { %v1059_v41 = vpop.eup %1058 }
 0x253   :  { %v657_v10 = vmul.f32 %v1059_v41, %v655_v63 }
 0x255   :  { %v659_v11 = vadd.f32 1.0, %v657_v10 }
 0x257   :  { %1060 = vrcp.f32 %v659_v11 }
 0x25d   :  { %v1061_v61 = vpop.eup %1060 }
 0x25e   :  { %v663_v3 = vsub.f32 0.0, %v1061_v61 }
 0x25f   :  { %790 = vmatmul.bf16.gmra.mxu2 %v698_v28 }
 0x260   :  { %v692_v49 = vmul.f32 %v676_v34, %v663_v3  ;;  %v693_v22 = vmul.f32 %v677_v36, %v663_v3  ;;  %v688_v6 = vmul.f32 %v672_v40, %v663_v3  ;;  %v689_v43 = vmul.f32 %v673_v58, %v663_v3 }
 0x261   :  { %v690_v0 = vmul.f32 %v674_v23, %v663_v3  ;;  %v691_v17 = vmul.f32 %v675_v14, %v663_v3  ;;  %v694_v26 = vmul.f32 %v678_v24, %v663_v3  ;;  %v695_v32 = vmul.f32 %v679_v16, %v663_v3 }
 0x262   :  { %v702_v8 = vpack.c.bf16 %v693_v22, %v692_v49  ;;  %v700_v1 = vpack.c.bf16 %v689_v43, %v688_v6 }
 0x263   :  { %v701_v19 = vpack.c.bf16 %v691_v17, %v690_v0  ;;  %v703_v21 = vpack.c.bf16 %v695_v32, %v694_v26 }
 0x264   :  { %810 = vmatmul.bf16.vlgmr.msra.gmra.mxu3 %v702_v8 }
 0x26f   :  { %795 = vmatmul.bf16.gmra.mxu2 %v699_v50 }
 0x274   :  { %815 = vmatmul.bf16.gmra.mxu3 %v703_v21 }
 0x27f   :  { %800 = vmatmul.bf16.gmra.mxu2 %v700_v1 }
 0x28f   :  { %805 = vmatmul.bf16.gmra.mxu2 %v701_v19 }
 0x2c2   :  { %v781_v33 = vpop.f32.mrf.mxu2 }
 0x2c3   :  { %v782_v29 = vadd.f32 %v1013_v54, %v781_v33 }
 0x2c5   :  { %821 = vst [vmem:[#allocation11] sm:$0xff] %v782_v29 }
 0x2ca   :  { %v783_v51 = vpop.f32.mrf.mxu2 }
 0x2cb   :  { %v784_v27 = vadd.f32 %v1013_v54, %v783_v51 }
 0x2cd   :  { %822 = vst [vmem:[#allocation11 + $0x8] sm:$0xff] %v784_v27 }
 0x2d2   :  { %v786_v18 = vpop.f32.mrf.mxu2 }
 0x2d3   :  { %v787_v39 = vadd.f32 %v1013_v54, %v786_v18 }
 0x2d5   :  { %823 = vst [vmem:[#allocation11 + $0x10] sm:$0xff] %v787_v39 }
 0x2da   :  { %v788_v15 = vpop.f32.mrf.mxu2 }
 0x2db   :  { %v789_v12 = vadd.f32 %v1013_v54, %v788_v15 }
 0x2dd   :  { %824 = vst [vmem:[#allocation11 + $0x18] sm:$0xff] %v789_v12 }
 0x2e2   :  { %v791_v42 = vpop.f32.mrf.mxu2 }
 0x2e3   :  { %v792_v44 = vadd.f32 %v1013_v54, %v791_v42 }
 0x2e5   :  { %825 = vst [vmem:[#allocation11 + $0x20] sm:$0xff] %v792_v44 }
 0x2e7   :  { %v811_v5 = vpop.f32.mrf.mxu3 }
 0x2e8   :  { %v812_v28 = vadd.f32 %v1013_v54, %v811_v5 }
 0x2ea   :  { %833 = vst [vmem:[#allocation11 + $0x60] sm:$0xff] %v812_v28  ;;  %v793_v52 = vpop.f32.mrf.mxu2 }
 0x2eb   :  { %v794_v31 = vadd.f32 %v1013_v54, %v793_v52 }
 0x2ed   :  { %826 = vst [vmem:[#allocation11 + $0x28] sm:$0xff] %v794_v31 }
 0x2ef   :  { %v813_v50 = vpop.f32.mrf.mxu3 }
 0x2f0   :  { %v814_v13 = vadd.f32 %v1013_v54, %v813_v50 }
 0x2f2   :  { %834 = vst [vmem:[#allocation11 + $0x68] sm:$0xff] %v814_v13  ;;  %v796_v45 = vpop.f32.mrf.mxu2 }
 0x2f3   :  { %v797_v53 = vadd.f32 %v1013_v54, %v796_v45 }
 0x2f5   :  { %827 = vst [vmem:[#allocation11 + $0x30] sm:$0xff] %v797_v53 }
 0x2f7   :  { %v816_v30 = vpop.f32.mrf.mxu3 }
 0x2f8   :  { %v817_v25 = vadd.f32 %v1013_v54, %v816_v30 }
 0x2fa   :  { %835 = vst [vmem:[#allocation11 + $0x70] sm:$0xff] %v817_v25  ;;  %v798_v20 = vpop.f32.mrf.mxu2 }
 0x2fb   :  { %v799_v59 = vadd.f32 %v1013_v54, %v798_v20 }
 0x2fd   :  { %828 = vst [vmem:[#allocation11 + $0x38] sm:$0xff] %v799_v59 }
 0x2ff   :  { %v818_v60 = vpop.f32.mrf.mxu3 }
 0x300   :  { %v819_v46 = vadd.f32 %v1013_v54, %v818_v60 }
 0x302   :  { %836 = vst [vmem:[#allocation11 + $0x78] sm:$0xff] %v819_v46  ;;  %v801_v38 = vpop.f32.mrf.mxu2 }
 0x303   :  { %v802_v4 = vadd.f32 %v1013_v54, %v801_v38 }
 0x305   :  { %829 = vst [vmem:[#allocation11 + $0x40] sm:$0xff] %v802_v4 }
 0x30a   :  { %v803_v48 = vpop.f32.mrf.mxu2 }
 0x30b   :  { %v804_v7 = vadd.f32 %v1013_v54, %v803_v48 }
 0x30d   :  { %830 = vst [vmem:[#allocation11 + $0x48] sm:$0xff] %v804_v7 }
 0x312   :  { %v806_v37 = vpop.f32.mrf.mxu2 }
 0x313   :  { %v807_v2 = vadd.f32 %v1013_v54, %v806_v37 }
 0x315   :  { %831 = vst [vmem:[#allocation11 + $0x50] sm:$0xff] %v807_v2 }
 0x31a   :  { %v808_v57 = vpop.f32.mrf.mxu2 }
 0x31b   :  { %v809_v63 = vadd.f32 %v1013_v54, %v808_v57 }
 0x31d   :  { %832 = vst [vmem:[#allocation11 + $0x58] sm:$0xff] %v809_v63 }
 0x31e   :  { %849 = dma.vmem_to_hbm [thread:$0]  %s842_s23, 2048, %s844_s28, [#allocation4], %s1215_s26, %s1215_s26, %s1216_s27  }
 0x31f   :  { %1212 = dma.done.wait [#allocation4], 2048  }
 0x320   :  { %1213 = vsyncadd [#allocation4], 4294965248 }
 0x321   :  { %854 = vsyncpa [#allocation3], 1 }
 0x322   :  { %855 = vsyncpa [#allocation6], 1 }
 0x323   :  { %856 = vsyncpa [#allocation9], 1 }
 0x324   :  { %857 = vsyncpa [#allocation4], 1 }

</bundles_post_ra>
